<compile_context>
chip_gen: v5e
topology: v5e:2x2
jax: 0.10.0
libtpu: 0.0.40
codegen_flags: <defaults>
</compile_context>

<pallas_src>
import functools

import jax
import jax.numpy as jnp
from jax.experimental import pallas as pl
from jax.experimental.pallas import tpu as pltpu
from jax.scipy.special import erf as _erf_ref


def _gelu(x, *, approx_recip=False):
    """Exact (erf-based) torch.nn.GELU(): 0.5*x*(1 + erf(x/sqrt(2))).

    erf via Abramowitz & Stegun 7.1.26 rational approximation (|err|<=1.5e-7),
    using only elementwise ops that lower cleanly in Mosaic.  With
    approx_recip=True the 1/(1+p*|z|) goes to the EUP reciprocal slot (frees
    VALU, but grows the error to ~1e-3 -> gated off by default).
    """
    a1, a2, a3, a4, a5 = (0.254829592, -0.284496736, 1.421413741,
                          -1.453152027, 1.061405429)
    p = 0.3275911
    z = x * 0.7071067811865476
    az = jnp.abs(z)
    denom = 1.0 + p * az
    if approx_recip:
        t = pl.reciprocal(denom, approx=True)
    else:
        t = 1.0 / denom
    poly = ((((a5 * t + a4) * t + a3) * t + a2) * t + a1) * t
    erf_abs = 1.0 - poly * jnp.exp(-az * az)
    erf_z = jnp.where(z >= 0.0, erf_abs, -erf_abs)
    return 0.5 * x * (1.0 + erf_z)


def _mlp_kernel_rows(x_ref, w1_ref, b1_ref, w2_ref, b2_ref, o_ref, *, approx_gelu):
    """Row-major path (emb_dim >= 128): x tile (TM, D), emb on the lane axis."""
    h = jnp.dot(x_ref[...], w1_ref[...], preferred_element_type=jnp.float32)
    h = h + b1_ref[...].astype(jnp.float32)          # (1, H) broadcast over rows
    h = _gelu(h, approx_recip=approx_gelu)
    h = h.astype(w2_ref.dtype)                       # bf16-native MXU when bf16
    y = jnp.dot(h, w2_ref[...], preferred_element_type=jnp.float32)
    y = y + b2_ref[...].astype(jnp.float32)
    o_ref[...] = y.astype(o_ref.dtype)


def _mlp_kernel_cols(xT_ref, w1T_ref, b1_ref, w2T_ref, b2_ref, o_ref, *, approx_gelu):
    """Lane-dense path (emb_dim < 128): x^T tile (D, TM), rows on the lane axis."""
    h = jnp.dot(w1T_ref[...], xT_ref[...],
                preferred_element_type=jnp.float32)  # (H, TM)
    h = h + b1_ref[...].astype(jnp.float32)          # (H, 1) broadcast over lanes
    h = _gelu(h, approx_recip=approx_gelu)
    h = h.astype(w2T_ref.dtype)
    y = jnp.dot(w2T_ref[...], h,
                preferred_element_type=jnp.float32)  # (D, TM)
    y = y + b2_ref[...].astype(jnp.float32)
    o_ref[...] = y.astype(o_ref.dtype)


def _round_up(n, m):
    return ((n + m - 1) // m) * m


def _cdiv(a, b):
    return (a + b - 1) // b


def _vmem_capacity_bytes():
    try:
        return int(pltpu.get_tpu_info().vmem_capacity_bytes)
    except Exception:
        return 64 << 20            # conservative (v7x-sized) fallback


def _weight_spec(shape, weight_buffers):
    # Constant-index block: it never changes across the row grid, so a single
    # buffer halves its resident VMEM footprint (it is fetched exactly once).
    if weight_buffers == 1:
        return pl.BlockSpec(shape, lambda i: (0, 0), pipeline_mode=pl.Buffered(1))
    return pl.BlockSpec(shape, lambda i: (0, 0))


@functools.partial(jax.jit,
                   static_argnames=("tile_m", "approx_gelu", "weight_buffers"))
def _tnt_mlp(x, w1, b1, w2, b2, *, tile_m, approx_gelu, weight_buffers):
    *lead, D = x.shape
    H = w1.shape[1]
    M = 1
    for d in lead:
        M *= d
    x2 = x.reshape(M, D)

    in_bytes = jnp.dtype(x.dtype).itemsize
    w_bytes = jnp.dtype(w1.dtype).itemsize

    # Small emb_dim (TNT MLPs at D < 128): rows go on the lane axis so output
    # stores are unmasked 128-lane vst and fc2's MXU N dim is TM, not D.
    lane_dense = D < 128
    if lane_dense:
        align, target = 128, 512
    else:
        align = 8 if x.dtype == jnp.float32 else 16
        target = 256

    if tile_m is None:
        # Balance the tile against M (padding <= one alignment unit) and use
        # >= 2 grid steps when M permits so both v7x TensorCores get work.
        min_steps = 2 if M > align else 1
        n_steps = max(_cdiv(M, target), min_steps)
        tm = _round_up(_cdiv(M, n_steps), align)
    else:
        tm = max(align, _round_up(tile_m, align))
    M_pad = _round_up(M, tm)
    grid = (M_pad // tm,)

    # Scoped-VMEM budget: double-buffered x/out tiles, weight/bias buffers,
    # f32 intermediates, headroom -- capped at this generation's physical VMEM
    # minus compiler-scratch headroom.
    vmem_need = (
        2 * tm * D * in_bytes                              # x tile (2 bufs)
        + 2 * tm * D * in_bytes                            # out tile (2 bufs)
        + weight_buffers * (2 * D * H + H + D) * w_bytes   # weights + biases
        + 8 * tm * (H + D)                                 # f32 intermediates
    )
    vmem_cap = _vmem_capacity_bytes()
    vmem_limit = int(min(max(vmem_need + (4 << 20), 32 << 20),
                         vmem_cap - (12 << 20)))

    cost = pl.CostEstimate(
        flops=4 * M_pad * D * H,                 # two matmuls
        transcendentals=M_pad * H,               # exp in the GELU
        bytes_accessed=2 * M_pad * D * in_bytes + (2 * D * H + H + D) * w_bytes,
    )
    cparams = pltpu.CompilerParams(
        dimension_semantics=("parallel",),
        vmem_limit_bytes=vmem_limit,
    )

    if lane_dense:
        xT = x2.T                                # (D, M): rows on the lane axis
        if M_pad != M:
            xT = jnp.pad(xT, ((0, 0), (0, M_pad - M)))
        kernel = functools.partial(_mlp_kernel_cols, approx_gelu=approx_gelu)
        out = pl.pallas_call(
            kernel,
            out_shape=jax.ShapeDtypeStruct((D, M_pad), x.dtype),
            grid_spec=pltpu.PrefetchScalarGridSpec(
                num_scalar_prefetch=0,
                grid=grid,
                in_specs=[
                    pl.BlockSpec((D, tm), lambda i: (0, i)),   # x^T col tile
                    _weight_spec((H, D), weight_buffers),      # W1^T (resident)
                    _weight_spec((H, 1), weight_buffers),      # b1
                    _weight_spec((D, H), weight_buffers),      # W2^T (resident)
                    _weight_spec((D, 1), weight_buffers),      # b2
                ],
                out_specs=pl.BlockSpec((D, tm), lambda i: (0, i)),
            ),
            compiler_params=cparams,
            cost_estimate=cost,
        )(xT, w1.T, b1.reshape(H, 1), w2.T, b2.reshape(D, 1))
        out = out[:, :M].T
    else:
        if M_pad != M:
            x2 = jnp.pad(x2, ((0, M_pad - M), (0, 0)))
        kernel = functools.partial(_mlp_kernel_rows, approx_gelu=approx_gelu)
        out = pl.pallas_call(
            kernel,
            out_shape=jax.ShapeDtypeStruct((M_pad, D), x.dtype),
            grid_spec=pltpu.PrefetchScalarGridSpec(
                num_scalar_prefetch=0,
                grid=grid,
                in_specs=[
                    pl.BlockSpec((tm, D), lambda i: (i, 0)),   # x row tile
                    _weight_spec((D, H), weight_buffers),      # W1 (resident)
                    _weight_spec((1, H), weight_buffers),      # b1
                    _weight_spec((H, D), weight_buffers),      # W2 (resident)
                    _weight_spec((1, D), weight_buffers),      # b2
                ],
                out_specs=pl.BlockSpec((tm, D), lambda i: (i, 0)),
            ),
            compiler_params=cparams,
            cost_estimate=cost,
        )(x2, w1, b1.reshape(1, H), w2, b2.reshape(1, D))
        out = out[:M]

    return out.reshape(*lead, D)


_WEIGHT_BUFFERS = None   # probed once: 1 if pl.Buffered(1) is supported, else 2


def tnt_mlp(x, w1, b1, w2, b2, *, tile_m=None, approx_gelu=False):
    """tnt_MLP forward.  x: (..., D); w1: (D, H); b1: (H,); w2: (H, D); b2: (D,)."""
    global _WEIGHT_BUFFERS
    if _WEIGHT_BUFFERS is None:
        try:
            out = _tnt_mlp(x, w1, b1, w2, b2, tile_m=tile_m,
                           approx_gelu=approx_gelu, weight_buffers=1)
            jax.block_until_ready(out)
            _WEIGHT_BUFFERS = 1
            return out
        except Exception:
            # This JAX build rejects single-buffered constant blocks; fall back
            # to default double-buffered weights (correctness unaffected).
            _WEIGHT_BUFFERS = 2
    return _tnt_mlp(x, w1, b1, w2, b2, tile_m=tile_m,
                    approx_gelu=approx_gelu, weight_buffers=_WEIGHT_BUFFERS)


def _reference(x, w1, b1, w2, b2):
    x32 = x.astype(jnp.float32)
    h = x32 @ w1.astype(jnp.float32) + b1.astype(jnp.float32)
    h = 0.5 * h * (1.0 + _erf_ref(h / jnp.sqrt(2.0)))      # exact GELU
    y = h @ w2.astype(jnp.float32) + b2.astype(jnp.float32)
    return y.astype(x.dtype)


if __name__ == "__main__":
    # tnt_MLP(emb_dim=32, expansion=4) on x of shape (batch=2, seq=8, emb_dim=32).
    B, S, D = 2, 8, 32
    expansion = 4
    H = expansion * D

    key = jax.random.PRNGKey(0)
    kx, k1, kb1, k2, kb2 = jax.random.split(key, 5)

    x = jax.random.normal(kx, (B, S, D), dtype=jnp.float32)

    # fc1 / fc2 weights stored already-transposed ((in, out)) so the math is
    # x @ W + b, numerically identical to PyTorch's x @ W.T + b.
    w1 = jax.random.normal(k1, (D, H), dtype=jnp.float32) * 0.02
    b1 = jax.random.normal(kb1, (H,), dtype=jnp.float32) * 0.02
    w2 = jax.random.normal(k2, (H, D), dtype=jnp.float32) * 0.02
    b2 = jax.random.normal(kb2, (D,), dtype=jnp.float32) * 0.02

    out = tnt_mlp(x, w1, b1, w2, b2)
    jax.block_until_ready(out)

    ref = _reference(x, w1, b1, w2, b2)
    assert out.shape == ref.shape
    assert jnp.allclose(out, ref, atol=1e-4, rtol=1e-4), "mismatch vs reference"

    print("KERNEL_OK")
</pallas_src>

<mosaic_0001>
module attributes {stable_mosaic.version = 11 : i64} {
  func.func @_mlp_kernel_cols(%arg0: i32, %arg1: memref<32x128xf32, #tpu.memory_space<vmem>>, %arg2: memref<128x32xf32, #tpu.memory_space<vmem>>, %arg3: memref<128x1xf32, #tpu.memory_space<vmem>>, %arg4: memref<32x128xf32, #tpu.memory_space<vmem>>, %arg5: memref<32x1xf32, #tpu.memory_space<vmem>>, %arg6: memref<32x128xf32, #tpu.memory_space<vmem>>) attributes {dimension_semantics = [#tpu.dimension_semantics<parallel>], iteration_bounds = array<i64: 1>, scalar_prefetch = 0 : i64, scratch_operands = 0 : i64, tpu.core_type = #tpu.core_type<tc>, window_params = [{transform_indices = @transform_0, window_bounds = array<i64: 32, 128>}, {pipeline_mode = #tpu.pipeline_mode<synchronous>, transform_indices = @transform_1, window_bounds = array<i64: 128, 32>}, {pipeline_mode = #tpu.pipeline_mode<synchronous>, transform_indices = @transform_2, window_bounds = array<i64: 128, 1>}, {pipeline_mode = #tpu.pipeline_mode<synchronous>, transform_indices = @transform_3, window_bounds = array<i64: 32, 128>}, {pipeline_mode = #tpu.pipeline_mode<synchronous>, transform_indices = @transform_4, window_bounds = array<i64: 32, 1>}, {transform_indices = @transform_5, window_bounds = array<i64: 32, 128>}]} {
    %c0 = arith.constant 0 : index
    %c0_0 = arith.constant 0 : index
    %0 = vector.load %arg2[%c0, %c0_0] : memref<128x32xf32, #tpu.memory_space<vmem>>, vector<128x32xf32>
    %c0_1 = arith.constant 0 : index
    %c0_2 = arith.constant 0 : index
    %1 = vector.load %arg1[%c0_1, %c0_2] : memref<32x128xf32, #tpu.memory_space<vmem>>, vector<32x128xf32>
    %cst = arith.constant dense<0.000000e+00> : vector<128x128xf32>
    %2 = tpu.matmul %0, %1, %cst {dimension_numbers = #tpu.dot_dimension_numbers<[1], [0], [0], [1], [0, 0, 1, 1], [], []>} : vector<128x32xf32>, vector<32x128xf32>, vector<128x128xf32> -> vector<128x128xf32>
    %c0_3 = arith.constant 0 : index
    %c0_4 = arith.constant 0 : index
    %3 = vector.load %arg3[%c0_3, %c0_4] : memref<128x1xf32, #tpu.memory_space<vmem>>, vector<128x1xf32>
    %4 = vector.broadcast %3 : vector<128x1xf32> to vector<128x128xf32>
    %5 = arith.addf %2, %4 : vector<128x128xf32>
    %cst_5 = arith.constant 0.707106769 : f32
    %6 = vector.broadcast %cst_5 : f32 to vector<128x128xf32>
    %7 = arith.mulf %5, %6 : vector<128x128xf32>
    %8 = math.absf %7 : vector<128x128xf32>
    %cst_6 = arith.constant 0.327591091 : f32
    %9 = vector.broadcast %cst_6 : f32 to vector<128x128xf32>
    %10 = arith.mulf %9, %8 : vector<128x128xf32>
    %cst_7 = arith.constant 1.000000e+00 : f32
    %11 = vector.broadcast %cst_7 : f32 to vector<128x128xf32>
    %12 = arith.addf %11, %10 : vector<128x128xf32>
    %cst_8 = arith.constant 1.000000e+00 : f32
    %13 = vector.broadcast %cst_8 : f32 to vector<128x128xf32>
    %14 = arith.divf %13, %12 : vector<128x128xf32>
    %cst_9 = arith.constant 1.06140542 : f32
    %15 = vector.broadcast %cst_9 : f32 to vector<128x128xf32>
    %16 = arith.mulf %15, %14 : vector<128x128xf32>
    %cst_10 = arith.constant -1.45315206 : f32
    %17 = vector.broadcast %cst_10 : f32 to vector<128x128xf32>
    %18 = arith.addf %16, %17 : vector<128x128xf32>
    %19 = arith.mulf %18, %14 : vector<128x128xf32>
    %cst_11 = arith.constant 1.42141378 : f32
    %20 = vector.broadcast %cst_11 : f32 to vector<128x128xf32>
    %21 = arith.addf %19, %20 : vector<128x128xf32>
    %22 = arith.mulf %21, %14 : vector<128x128xf32>
    %cst_12 = arith.constant -0.284496725 : f32
    %23 = vector.broadcast %cst_12 : f32 to vector<128x128xf32>
    %24 = arith.addf %22, %23 : vector<128x128xf32>
    %25 = arith.mulf %24, %14 : vector<128x128xf32>
    %cst_13 = arith.constant 0.254829586 : f32
    %26 = vector.broadcast %cst_13 : f32 to vector<128x128xf32>
    %27 = arith.addf %25, %26 : vector<128x128xf32>
    %28 = arith.mulf %27, %14 : vector<128x128xf32>
    %cst_14 = arith.constant 0.000000e+00 : f32
    %29 = vector.broadcast %cst_14 : f32 to vector<128x128xf32>
    %30 = arith.subf %29, %8 : vector<128x128xf32>
    %31 = arith.mulf %30, %8 : vector<128x128xf32>
    %32 = math.exp %31 : vector<128x128xf32>
    %33 = arith.mulf %28, %32 : vector<128x128xf32>
    %cst_15 = arith.constant 1.000000e+00 : f32
    %34 = vector.broadcast %cst_15 : f32 to vector<128x128xf32>
    %35 = arith.subf %34, %33 : vector<128x128xf32>
    %cst_16 = arith.constant 0.000000e+00 : f32
    %36 = vector.broadcast %cst_16 : f32 to vector<128x128xf32>
    %37 = arith.cmpf oge, %7, %36 : vector<128x128xf32>
    %cst_17 = arith.constant 0.000000e+00 : f32
    %38 = vector.broadcast %cst_17 : f32 to vector<128x128xf32>
    %39 = arith.subf %38, %35 : vector<128x128xf32>
    %40 = arith.select %37, %35, %39 : vector<128x128xi1>, vector<128x128xf32>
    %cst_18 = arith.constant 5.000000e-01 : f32
    %41 = vector.broadcast %cst_18 : f32 to vector<128x128xf32>
    %42 = arith.mulf %41, %5 : vector<128x128xf32>
    %cst_19 = arith.constant 1.000000e+00 : f32
    %43 = vector.broadcast %cst_19 : f32 to vector<128x128xf32>
    %44 = arith.addf %43, %40 : vector<128x128xf32>
    %45 = arith.mulf %42, %44 : vector<128x128xf32>
    %c0_20 = arith.constant 0 : index
    %c0_21 = arith.constant 0 : index
    %46 = vector.load %arg4[%c0_20, %c0_21] : memref<32x128xf32, #tpu.memory_space<vmem>>, vector<32x128xf32>
    %cst_22 = arith.constant dense<0.000000e+00> : vector<32x128xf32>
    %47 = tpu.matmul %46, %45, %cst_22 {dimension_numbers = #tpu.dot_dimension_numbers<[1], [0], [0], [1], [0, 0, 1, 1], [], []>} : vector<32x128xf32>, vector<128x128xf32>, vector<32x128xf32> -> vector<32x128xf32>
    %c0_23 = arith.constant 0 : index
    %c0_24 = arith.constant 0 : index
    %48 = vector.load %arg5[%c0_23, %c0_24] : memref<32x1xf32, #tpu.memory_space<vmem>>, vector<32x1xf32>
    %49 = vector.broadcast %48 : vector<32x1xf32> to vector<32x128xf32>
    %50 = arith.addf %47, %49 : vector<32x128xf32>
    %c0_25 = arith.constant 0 : index
    %c0_26 = arith.constant 0 : index
    %51 = vector.load %arg6[%c0_25, %c0_26] : memref<32x128xf32, #tpu.memory_space<vmem>>, vector<32x128xf32>
    tpu.vector_store %arg6[%c0_25, %c0_26], %50 {strides = array<i32>} : memref<32x128xf32, #tpu.memory_space<vmem>>, vector<32x128xf32>,
    return
  }
  func.func @transform_0(%arg0: i32) -> (i32, i32) {
    %c0_i32 = arith.constant 0 : i32
    %c0_i32_0 = arith.constant 0 : i32
    return %c0_i32, %arg0 : i32, i32
  }
  func.func @transform_1(%arg0: i32) -> (i32, i32) {
    %c0_i32 = arith.constant 0 : i32
    %c0_i32_0 = arith.constant 0 : i32
    %c0_i32_1 = arith.constant 0 : i32
    return %c0_i32, %c0_i32_0 : i32, i32
  }
  func.func @transform_2(%arg0: i32) -> (i32, i32) {
    %c0_i32 = arith.constant 0 : i32
    %c0_i32_0 = arith.constant 0 : i32
    %c0_i32_1 = arith.constant 0 : i32
    return %c0_i32, %c0_i32_0 : i32, i32
  }
  func.func @transform_3(%arg0: i32) -> (i32, i32) {
    %c0_i32 = arith.constant 0 : i32
    %c0_i32_0 = arith.constant 0 : i32
    %c0_i32_1 = arith.constant 0 : i32
    return %c0_i32, %c0_i32_0 : i32, i32
  }
  func.func @transform_4(%arg0: i32) -> (i32, i32) {
    %c0_i32 = arith.constant 0 : i32
    %c0_i32_0 = arith.constant 0 : i32
    %c0_i32_1 = arith.constant 0 : i32
    return %c0_i32, %c0_i32_0 : i32, i32
  }
  func.func @transform_5(%arg0: i32) -> (i32, i32) {
    %c0_i32 = arith.constant 0 : i32
    %c0_i32_0 = arith.constant 0 : i32
    return %c0_i32, %arg0 : i32, i32
  }
}

module attributes {stable_mosaic.version = 11 : i64} {
  func.func @_mlp_kernel_cols(%arg0: i32, %arg1: memref<32x128xf32, #tpu.memory_space<vmem>>, %arg2: memref<128x32xf32, #tpu.memory_space<vmem>>, %arg3: memref<128x1xf32, #tpu.memory_space<vmem>>, %arg4: memref<32x128xf32, #tpu.memory_space<vmem>>, %arg5: memref<32x1xf32, #tpu.memory_space<vmem>>, %arg6: memref<32x128xf32, #tpu.memory_space<vmem>>) attributes {dimension_semantics = [#tpu.dimension_semantics<parallel>], iteration_bounds = array<i64: 1>, scalar_prefetch = 0 : i64, scratch_operands = 0 : i64, tpu.core_type = #tpu.core_type<tc>, window_params = [{transform_indices = @transform_0, window_bounds = array<i64: 32, 128>}, {pipeline_mode = #tpu.pipeline_mode<synchronous>, transform_indices = @transform_1, window_bounds = array<i64: 128, 32>}, {pipeline_mode = #tpu.pipeline_mode<synchronous>, transform_indices = @transform_2, window_bounds = array<i64: 128, 1>}, {pipeline_mode = #tpu.pipeline_mode<synchronous>, transform_indices = @transform_3, window_bounds = array<i64: 32, 128>}, {pipeline_mode = #tpu.pipeline_mode<synchronous>, transform_indices = @transform_4, window_bounds = array<i64: 32, 1>}, {transform_indices = @transform_5, window_bounds = array<i64: 32, 128>}]} {
    %c0 = arith.constant 0 : index
    %c0_0 = arith.constant 0 : index
    %0 = vector.load %arg2[%c0, %c0_0] : memref<128x32xf32, #tpu.memory_space<vmem>>, vector<128x32xf32>
    %c0_1 = arith.constant 0 : index
    %c0_2 = arith.constant 0 : index
    %1 = vector.load %arg1[%c0_1, %c0_2] : memref<32x128xf32, #tpu.memory_space<vmem>>, vector<32x128xf32>
    %cst = arith.constant dense<0.000000e+00> : vector<128x128xf32>
    %2 = tpu.matmul %0, %1, %cst {dimension_numbers = #tpu.dot_dimension_numbers<[1], [0], [0], [1], [0, 0, 1, 1], [], []>} : vector<128x32xf32>, vector<32x128xf32>, vector<128x128xf32> -> vector<128x128xf32>
    %c0_3 = arith.constant 0 : index
    %c0_4 = arith.constant 0 : index
    %3 = vector.load %arg3[%c0_3, %c0_4] : memref<128x1xf32, #tpu.memory_space<vmem>>, vector<128x1xf32>
    %4 = vector.broadcast %3 : vector<128x1xf32> to vector<128x128xf32>
    %5 = arith.addf %2, %4 : vector<128x128xf32>
    %cst_5 = arith.constant 0.707106769 : f32
    %6 = vector.broadcast %cst_5 : f32 to vector<128x128xf32>
    %7 = arith.mulf %5, %6 : vector<128x128xf32>
    %8 = math.absf %7 : vector<128x128xf32>
    %cst_6 = arith.constant 0.327591091 : f32
    %9 = vector.broadcast %cst_6 : f32 to vector<128x128xf32>
    %10 = arith.mulf %9, %8 : vector<128x128xf32>
    %cst_7 = arith.constant 1.000000e+00 : f32
    %11 = vector.broadcast %cst_7 : f32 to vector<128x128xf32>
    %12 = arith.addf %11, %10 : vector<128x128xf32>
    %cst_8 = arith.constant 1.000000e+00 : f32
    %13 = vector.broadcast %cst_8 : f32 to vector<128x128xf32>
    %14 = arith.divf %13, %12 : vector<128x128xf32>
    %cst_9 = arith.constant 1.06140542 : f32
    %15 = vector.broadcast %cst_9 : f32 to vector<128x128xf32>
    %16 = arith.mulf %15, %14 : vector<128x128xf32>
    %cst_10 = arith.constant -1.45315206 : f32
    %17 = vector.broadcast %cst_10 : f32 to vector<128x128xf32>
    %18 = arith.addf %16, %17 : vector<128x128xf32>
    %19 = arith.mulf %18, %14 : vector<128x128xf32>
    %cst_11 = arith.constant 1.42141378 : f32
    %20 = vector.broadcast %cst_11 : f32 to vector<128x128xf32>
    %21 = arith.addf %19, %20 : vector<128x128xf32>
    %22 = arith.mulf %21, %14 : vector<128x128xf32>
    %cst_12 = arith.constant -0.284496725 : f32
    %23 = vector.broadcast %cst_12 : f32 to vector<128x128xf32>
    %24 = arith.addf %22, %23 : vector<128x128xf32>
    %25 = arith.mulf %24, %14 : vector<128x128xf32>
    %cst_13 = arith.constant 0.254829586 : f32
    %26 = vector.broadcast %cst_13 : f32 to vector<128x128xf32>
    %27 = arith.addf %25, %26 : vector<128x128xf32>
    %28 = arith.mulf %27, %14 : vector<128x128xf32>
    %cst_14 = arith.constant 0.000000e+00 : f32
    %29 = vector.broadcast %cst_14 : f32 to vector<128x128xf32>
    %30 = arith.subf %29, %8 : vector<128x128xf32>
    %31 = arith.mulf %30, %8 : vector<128x128xf32>
    %32 = math.exp %31 : vector<128x128xf32>
    %33 = arith.mulf %28, %32 : vector<128x128xf32>
    %cst_15 = arith.constant 1.000000e+00 : f32
    %34 = vector.broadcast %cst_15 : f32 to vector<128x128xf32>
    %35 = arith.subf %34, %33 : vector<128x128xf32>
    %cst_16 = arith.constant 0.000000e+00 : f32
    %36 = vector.broadcast %cst_16 : f32 to vector<128x128xf32>
    %37 = arith.cmpf oge, %7, %36 : vector<128x128xf32>
    %cst_17 = arith.constant 0.000000e+00 : f32
    %38 = vector.broadcast %cst_17 : f32 to vector<128x128xf32>
    %39 = arith.subf %38, %35 : vector<128x128xf32>
    %40 = arith.select %37, %35, %39 : vector<128x128xi1>, vector<128x128xf32>
    %cst_18 = arith.constant 5.000000e-01 : f32
    %41 = vector.broadcast %cst_18 : f32 to vector<128x128xf32>
    %42 = arith.mulf %41, %5 : vector<128x128xf32>
    %cst_19 = arith.constant 1.000000e+00 : f32
    %43 = vector.broadcast %cst_19 : f32 to vector<128x128xf32>
    %44 = arith.addf %43, %40 : vector<128x128xf32>
    %45 = arith.mulf %42, %44 : vector<128x128xf32>
    %c0_20 = arith.constant 0 : index
    %c0_21 = arith.constant 0 : index
    %46 = vector.load %arg4[%c0_20, %c0_21] : memref<32x128xf32, #tpu.memory_space<vmem>>, vector<32x128xf32>
    %cst_22 = arith.constant dense<0.000000e+00> : vector<32x128xf32>
    %47 = tpu.matmul %46, %45, %cst_22 {dimension_numbers = #tpu.dot_dimension_numbers<[1], [0], [0], [1], [0, 0, 1, 1], [], []>} : vector<32x128xf32>, vector<128x128xf32>, vector<32x128xf32> -> vector<32x128xf32>
    %c0_23 = arith.constant 0 : index
    %c0_24 = arith.constant 0 : index
    %48 = vector.load %arg5[%c0_23, %c0_24] : memref<32x1xf32, #tpu.memory_space<vmem>>, vector<32x1xf32>
    %49 = vector.broadcast %48 : vector<32x1xf32> to vector<32x128xf32>
    %50 = arith.addf %47, %49 : vector<32x128xf32>
    %c0_25 = arith.constant 0 : index
    %c0_26 = arith.constant 0 : index
    %51 = vector.load %arg6[%c0_25, %c0_26] : memref<32x128xf32, #tpu.memory_space<vmem>>, vector<32x128xf32>
    tpu.vector_store %arg6[%c0_25, %c0_26], %50 {strides = array<i32>} : memref<32x128xf32, #tpu.memory_space<vmem>>, vector<32x128xf32>,
    return
  }
  func.func @transform_0(%arg0: i32) -> (i32, i32) {
    %c0_i32 = arith.constant 0 : i32
    %c0_i32_0 = arith.constant 0 : i32
    return %c0_i32, %arg0 : i32, i32
  }
  func.func @transform_1(%arg0: i32) -> (i32, i32) {
    %c0_i32 = arith.constant 0 : i32
    %c0_i32_0 = arith.constant 0 : i32
    %c0_i32_1 = arith.constant 0 : i32
    return %c0_i32, %c0_i32_0 : i32, i32
  }
  func.func @transform_2(%arg0: i32) -> (i32, i32) {
    %c0_i32 = arith.constant 0 : i32
    %c0_i32_0 = arith.constant 0 : i32
    %c0_i32_1 = arith.constant 0 : i32
    return %c0_i32, %c0_i32_0 : i32, i32
  }
  func.func @transform_3(%arg0: i32) -> (i32, i32) {
    %c0_i32 = arith.constant 0 : i32
    %c0_i32_0 = arith.constant 0 : i32
    %c0_i32_1 = arith.constant 0 : i32
    return %c0_i32, %c0_i32_0 : i32, i32
  }
  func.func @transform_4(%arg0: i32) -> (i32, i32) {
    %c0_i32 = arith.constant 0 : i32
    %c0_i32_0 = arith.constant 0 : i32
    %c0_i32_1 = arith.constant 0 : i32
    return %c0_i32, %c0_i32_0 : i32, i32
  }
  func.func @transform_5(%arg0: i32) -> (i32, i32) {
    %c0_i32 = arith.constant 0 : i32
    %c0_i32_0 = arith.constant 0 : i32
    return %c0_i32, %arg0 : i32, i32
  }
}

</mosaic_0001>

<bundles_post_ra>
// kernel: _tnt_mlp.1
= control target key start
LH: loop header
LB: loop body
LE: loop exit
PB: predicated region body
PF: predicated region fallthrough
CT: control target
= control target key end

     0   :  { %v1063_v0 = vmov 0   ;;  %vm136_vm0 = vcmask 261120   ;;  %s2033_s2 = inlined_call_operand.vmem [shape: f32[128,1], index: 2, kind: input, shape index: {}]   ;;  %s2034_s0 = inlined_call_operand.vmem [shape: f32[32,128], index: 0, kind: input, shape index: {}]   ;;  %s2035_s1 = inlined_call_operand.vmem [shape: f32[128,32], index: 1, kind: input, shape index: {}]   ;;  %s2036_s4 = inlined_call_operand.vmem [shape: f32[32,1], index: 4, kind: input, shape index: {}]   ;;  %s2037_s3 = inlined_call_operand.vmem [shape: f32[32,128], index: 3, kind: input, shape index: {}]   ;;  %s2038_s5 = inlined_call_operand.vmem [shape: f32[32,128], index: 5, kind: output, shape index: {}]  }
   0x1   :  { %996 = vset.pattern.permute.xlu0 %v1063_v0  ;;  %v55_v1 = vld [vmem:[%s2033_s2 + $0x78] sm:$0xff]  ;;  %997 = vset.pattern.permute.xlu1 %v1063_v0  ;;  %v53_v3 = vld [vmem:[%s2033_s2 + $0x68] sm:$0xff]  ;;  %v38_v4 = vld [vmem:[%s2034_s0 + $0x10] sm:$0xff] }
   0x2   :  { %v39_v2 = vld [vmem:[%s2034_s0 + $0x18] sm:$0xff]  ;;  %133 = vperm.xlu0 %996, %v55_v1   ;;  %v37_v5 = vld [vmem:[%s2034_s0 + $0x8] sm:$0xff]  ;;  %123 = vperm.xlu1 %997, %v53_v3   ;;  %v36_v6 = vld [vmem:[%s2034_s0] sm:$0xff] }
   0x3   :  { %197 = vmatpush.msra.mxu0 %v39_v2  ;;  %971 = vmatpush.msra.mxu2 %v39_v2  ;;  %v51_v7 = vld [vmem:[%s2033_s2 + $0x58] sm:$0xff]  ;;  %v20_v8 = vld [vmem:[%s2035_s1] sm:$0xff]  ;;  %v26_v9 = vld [vmem:[%s2035_s1 + $0x30] sm:$0xff] }
   0x4   :  { %972 = vmatpush.msra.mxu3 %v39_v2  ;;  %998 = vset.pattern.permute.xlu2 %v1063_v0  ;;  %v32_v10 = vld [vmem:[%s2035_s1 + $0x60] sm:$0xff]  ;;  %v54_v11 = vld [vmem:[%s2033_s2 + $0x70] sm:$0xff]  ;;  %v21_v14 = vld [vmem:[%s2035_s1 + $0x8] sm:$0xff] }
   0x5   :  { %198 = vmatpush.msra.mxu0 %v38_v4  ;;  %973 = vmatpush.msra.mxu2 %v38_v4  ;;  %v52_v12 = vld [vmem:[%s2033_s2 + $0x60] sm:$0xff]  ;;  %v50_v13 = vld [vmem:[%s2033_s2 + $0x50] sm:$0xff]  ;;  %v27_v15 = vld [vmem:[%s2035_s1 + $0x38] sm:$0xff] }
   0x6   :  { %974 = vmatpush.msra.mxu3 %v38_v4  ;;  %113 = vperm.xlu2 %998, %v51_v7   ;;  %v33_v16 = vld [vmem:[%s2035_s1 + $0x68] sm:$0xff]  ;;  %v48_v18 = vld [vmem:[%s2033_s2 + $0x40] sm:$0xff]  ;;  %v47_v19 = vld [vmem:[%s2033_s2 + $0x38] sm:$0xff] }
   0x7   :  { %199 = vmatpush.msra.mxu0 %v37_v5  ;;  %975 = vmatpush.msra.mxu2 %v37_v5  ;;  %v49_v17 = vld [vmem:[%s2033_s2 + $0x48] sm:$0xff]  ;;  %v22_v20 = vld [vmem:[%s2035_s1 + $0x10] sm:$0xff]  ;;  %v28_v21 = vld [vmem:[%s2035_s1 + $0x40] sm:$0xff] }
   0x8   :  { %976 = vmatpush.msra.mxu3 %v37_v5  ;;  %v34_v22 = vld [vmem:[%s2035_s1 + $0x70] sm:$0xff]  ;;  %v45_v24 = vld [vmem:[%s2033_s2 + $0x28] sm:$0xff]  ;;  %v44_v25 = vld [vmem:[%s2033_s2 + $0x20] sm:$0xff] }
   0x9   :  { %200 = vmatpush.msra.mxu0 %v36_v6  ;;  %977 = vmatpush.msra.mxu2 %v36_v6  ;;  %v46_v23 = vld [vmem:[%s2033_s2 + $0x30] sm:$0xff]  ;;  %v23_v26 = vld [vmem:[%s2035_s1 + $0x18] sm:$0xff]  ;;  %v29_v27 = vld [vmem:[%s2035_s1 + $0x48] sm:$0xff] }
   0xa   :  { %978 = vmatpush.msra.mxu3 %v36_v6  ;;  %955 = vmatmul.msk.f32.vlgmr.msra.gmra.mxu0 %vm136_vm0, %v20_v8  ;;  %v35_v28 = vld [vmem:[%s2035_s1 + $0x78] sm:$0xff]  ;;  %v42_v30 = vld [vmem:[%s2033_s2 + $0x10] sm:$0xff]  ;;  %v41_v31 = vld [vmem:[%s2033_s2 + $0x8] sm:$0xff] }
   0xb   :  { %961 = vmatmul.msk.f32.vlgmr.msra.gmra.mxu2 %vm136_vm0, %v26_v9  ;;  %967 = vmatmul.msk.f32.vlgmr.msra.gmra.mxu3 %vm136_vm0, %v32_v10  ;;  %v43_v29 = vld [vmem:[%s2033_s2 + $0x18] sm:$0xff]  ;;  %v24_v32 = vld [vmem:[%s2035_s1 + $0x20] sm:$0xff]  ;;  %v30_v33 = vld [vmem:[%s2035_s1 + $0x50] sm:$0xff] }
   0xc   :  { %128 = vperm.xlu0 %996, %v54_v11   ;;  %118 = vperm.xlu1 %997, %v52_v12   ;;  %v40_v34 = vld [vmem:[%s2033_s2] sm:$0xff]  ;;  %v895_v36 = vld [vmem:[%s2036_s4 + $0x8] sm:$0xff]  ;;  %v31_v38 = vld [vmem:[%s2035_s1 + $0x58] sm:$0xff] }
   0xd   :  { %v894_v35 = vld [vmem:[%s2036_s4] sm:$0xff]  ;;  %v25_v37 = vld [vmem:[%s2035_s1 + $0x28] sm:$0xff]  ;;  %v896_v39 = vld [vmem:[%s2036_s4 + $0x10] sm:$0xff] }
   0xe   :  { %108 = vperm.xlu2 %998, %v50_v13   ;;  %v897_v40 = vld [vmem:[%s2036_s4 + $0x18] sm:$0xff] }
  0x12   :  { %956 = vmatmul.msk.f32.gmra.mxu0 %vm136_vm0, %v21_v14 }
  0x13   :  { %962 = vmatmul.msk.f32.gmra.mxu2 %vm136_vm0, %v27_v15  ;;  %968 = vmatmul.msk.f32.gmra.mxu3 %vm136_vm0, %v33_v16 }
  0x14   :  { %103 = vperm.xlu0 %996, %v49_v17   ;;  %98 = vperm.xlu1 %997, %v48_v18  }
  0x16   :  { %93 = vperm.xlu2 %998, %v47_v19  }
  0x1a   :  { %957 = vmatmul.msk.f32.gmra.mxu0 %vm136_vm0, %v22_v20 }
  0x1b   :  { %963 = vmatmul.msk.f32.gmra.mxu2 %vm136_vm0, %v28_v21  ;;  %969 = vmatmul.msk.f32.gmra.mxu3 %vm136_vm0, %v34_v22 }
  0x1c   :  { %88 = vperm.xlu0 %996, %v46_v23   ;;  %83 = vperm.xlu1 %997, %v45_v24  }
  0x1e   :  { %78 = vperm.xlu2 %998, %v44_v25  }
  0x22   :  { %958 = vmatmul.msk.f32.gmra.mxu0 %vm136_vm0, %v23_v26 }
  0x23   :  { %964 = vmatmul.msk.f32.gmra.mxu2 %vm136_vm0, %v29_v27  ;;  %970 = vmatmul.msk.f32.gmra.mxu3 %vm136_vm0, %v35_v28 }
  0x24   :  { %73 = vperm.xlu0 %996, %v43_v29   ;;  %68 = vperm.xlu1 %997, %v42_v30  }
  0x26   :  { %63 = vperm.xlu2 %998, %v41_v31  }
  0x2a   :  { %959 = vmatmul.msk.f32.gmra.mxu0 %vm136_vm0, %v24_v32 }
  0x2b   :  { %965 = vmatmul.msk.f32.gmra.mxu2 %vm136_vm0, %v30_v33 }
  0x2c   :  { %58 = vperm.xlu0 %996, %v40_v34   ;;  %900 = vperm.xlu1 %997, %v894_v35  }
  0x2e   :  { %905 = vperm.xlu2 %998, %v895_v36  }
  0x32   :  { %960 = vmatmul.msk.f32.gmra.mxu0 %vm136_vm0, %v25_v37 }
  0x33   :  { %966 = vmatmul.msk.f32.gmra.mxu2 %vm136_vm0, %v31_v38 }
  0x34   :  { %910 = vperm.xlu0 %996, %v896_v39   ;;  %915 = vperm.xlu1 %997, %v897_v40  }
  0x60   :  { %v1230_v41 = vpop.permute.xlu2 %113 }
  0x68   :  { %v1232_v42 = vpop.permute.xlu2 %108 }
  0x70   :  { %v94_v45 = vpop.permute.xlu2 %93 }
  0x74   :  { %v1234_v43 = vpop.permute.xlu0 %133  ;;  %v124_v44 = vpop.permute.xlu1 %123 }
  0x78   :  { %v1238_v48 = vpop.permute.xlu2 %78 }
  0x7e   :  { %v1236_v46 = vpop.permute.xlu0 %128  ;;  %v119_v47 = vpop.permute.xlu1 %118 }
  0x80   :  { %v64_v52 = vpop.permute.xlu2 %63 }
  0x86   :  { %v1240_v49 = vpop.permute.xlu0 %103  ;;  %v99_v50 = vpop.permute.xlu1 %98 }
  0x87   :  { %v202_v51 = vpop.f32.mrf.mxu0 }
  0x8e   :  { %v89_v53 = vpop.permute.xlu0 %88  ;;  %v220_v54 = vpop.f32.mrf.mxu2 }
  0x8f   :  { %v1242_v55 = vadd.f32 %v220_v54, %v89_v53  ;;  %v238_v56 = vpop.f32.mrf.mxu3  ;;  %v1246_v58 = vpop.permute.xlu1 %83 }
  0x90   :  { %v1244_v57 = vadd.f32 %v238_v56, %v119_v47  ;;  %v205_v59 = vpop.f32.mrf.mxu0 }
  0x91   :  { %v1249_v60 = vmul.f32 0.70710677, %v1242_v55  ;;  %v1251_v61 = vadd.f32 %v205_v59, %v64_v52 }
  0x92   :  { %v1254_v62 = vmul.f32 0.70710677, %v1244_v57 }
  0x93   :  { %2075 = vst [vmem:[#allocation2_spill] sm:$0xff] %v1249_v60  ;;  %v1257_v63 = vmul.f32 0.70710677, %v1251_v61  ;;  %v272_v0 = vand.u32 2147483647, %v1249_v60 }
  0x94   :  { %2076 = vst [vmem:[#allocation3_spill] sm:$0xff] %v1251_v61  ;;  %v278_v3 = vand.u32 2147483647, %v1254_v62 }
  0x95   :  { %2077 = vst [vmem:[#allocation4_spill] sm:$0xff] %v1257_v63  ;;  %v1264_v5 = vand.u32 2147483647, %v1257_v63  ;;  %v288_v8 = vmul.f32 0.3275911, %v272_v0  ;;  %v704_v13 = vsub.f32 0.0, %v272_v0 }
  0x96   :  { %v1260_v1 = vpop.permute.xlu0 %73  ;;  %v223_v2 = vpop.f32.mrf.mxu2  ;;  %v294_v11 = vmul.f32 0.3275911, %v278_v3  ;;  %v710_v25 = vsub.f32 0.0, %v278_v3 }
  0x97   :  { %v241_v4 = vpop.f32.mrf.mxu3  ;;  %v1266_v6 = vadd.f32 %v223_v2, %v94_v45  ;;  %v69_v9 = vpop.permute.xlu1 %68  ;;  %v283_v14 = vmul.f32 0.3275911, %v1264_v5  ;;  %v1277_v16 = vadd.f32 1.0, %v288_v8  ;;  %v720_v24 = vmul.f32 %v704_v13, %v272_v0 }
  0x98   :  { %v1268_v7 = vadd.f32 %v241_v4, %v124_v44  ;;  %v208_v10 = vpop.f32.mrf.mxu0  ;;  %v1283_v20 = vadd.f32 1.0, %v294_v11  ;;  %v726_v33 = vmul.f32 %v710_v25, %v278_v3  ;;  %v699_v59 = vsub.f32 0.0, %v1264_v5 }
  0x99   :  { %v1271_v12 = vmul.f32 0.70710677, %v1266_v6  ;;  %v1280_v18 = vadd.f32 %v208_v10, %v69_v9  ;;  %v1288_v26 = vadd.f32 1.0, %v283_v14  ;;  %999 = vrcp.f32 %v1277_v16 }
  0x9a   :  { %v1275_v15 = vmul.f32 0.70710677, %v1268_v7  ;;  %1001 = vrcp.f32 %v1283_v20  ;;  %v742_v32 = vmul.f32 1.442695, %v720_v24  ;;  %v754_v52 = vmul.f32 1.442695, %v726_v33 }
  0x9b   :  { %2078 = vst [vmem:[#allocation5_spill] sm:$0xff] %v1271_v12  ;;  %v273_v17 = vand.u32 2147483647, %v1271_v12  ;;  %v1286_v22 = vmul.f32 0.70710677, %v1280_v18  ;;  %1003 = vrcp.f32 %v1288_v26  ;;  %v1332_v8 = vmul.f32 0.5, %v1242_v55 }
  0x9c   :  { %2079 = vst [vmem:[#allocation6_spill] sm:$0xff] %v1280_v18  ;;  %v279_v19 = vand.u32 2147483647, %v1275_v15  ;;  %v1344_v14 = vmul.f32 0.5, %v1244_v57  ;;  %vm499_vm5 = vweird.f32 %v1283_v20 }
  0x9d   :  { %v289_v21 = vmul.f32 0.3275911, %v273_v17  ;;  %2080 = vst [vmem:[#allocation7_spill] sm:$0xff] %v1286_v22  ;;  %v1292_v28 = vand.u32 2147483647, %v1286_v22  ;;  %v705_v30 = vsub.f32 0.0, %v273_v17 }
  0x9e   :  { %v59_v23 = vpop.permute.xlu0 %58  ;;  %2081 = vst [vmem:[#allocation8_spill] sm:$0xff] %v1288_v26  ;;  %v295_v27 = vmul.f32 0.3275911, %v279_v19  ;;  %v226_v34 = vpop.f32.mrf.mxu2  ;;  %v711_v39 = vsub.f32 0.0, %v279_v19 }
  0x9f   :  { %v1294_v29 = vadd.f32 1.0, %v289_v21  ;;  %v1296_v31 = vadd.f32 %v202_v51, %v59_v23  ;;  %v244_v35 = vpop.f32.mrf.mxu3  ;;  %v284_v37 = vmul.f32 0.3275911, %v1292_v28  ;;  %v721_v38 = vmul.f32 %v705_v30, %v273_v17  ;;  %v1307_v44 = vpop.eup %999  ;;  %2088 = vst [vmem:[#allocation15_spill] sm:$0xff] %v1332_v8 }
  0xa0   :  { %v1300_v36 = vadd.f32 1.0, %v295_v27  ;;  %v1311_v47 = vadd.f32 %v226_v34, %v99_v50  ;;  %v1314_v51 = vadd.f32 %v244_v35, %v1236_v46  ;;  %v211_v54 = vpop.f32.mrf.mxu0  ;;  %v1319_v56 = vpop.eup %1001  ;;  %v405_v46 = vmul.f32 %v1307_v44, %v1277_v16 }
  0xa1   :  { %2082 = vst [vmem:[#allocation9_spill] sm:$0xff] %v1296_v31  ;;  %1005 = vrcp.f32 %v1294_v29  ;;  %v1305_v40 = vmul.f32 0.70710677, %v1296_v31  ;;  %v1309_v45 = vadd.f32 1.0, %v284_v37  ;;  %v1326_v50 = vpop.eup %1003  ;;  %v744_v2 = vmul.f32 1.442695, %v721_v38 }
  0xa2   :  { %1007 = vpow2.f32 %v742_v32  ;;  %v1324_v0 = vmul.f32 0.70710677, %v1311_v47  ;;  %2087 = vst [vmem:[#allocation14_spill] sm:$0xff] %v1326_v50  ;;  %v727_v3 = vmul.f32 %v711_v39, %v279_v19  ;;  %v1337_v10 = vmul.f32 0.70710677, %v1314_v51 }
  0xa3   :  { %2083 = vst [vmem:[#allocation10_spill] sm:$0xff] %v1305_v40  ;;  %v1317_v53 = vand.u32 2147483647, %v1305_v40  ;;  %1009 = vrcp.f32 %v1300_v36  ;;  %v495_v13 = vmul.f32 %v1319_v56, %v1283_v20  ;;  %v330_v55 = vmul.f32 %v1326_v50, %v1288_v26 }
  0xa4   :  { %2084 = vst [vmem:[#allocation11_spill] sm:$0xff] %v1309_v45  ;;  %1011 = vrcp.f32 %v1309_v45  ;;  %v274_v9 = vand.u32 2147483647, %v1324_v0  ;;  %v700_v19 = vsub.f32 0.0, %v1292_v28  ;;  %v280_v23 = vand.u32 2147483647, %v1337_v10 }
  0xa5   :  { %2085 = vst [vmem:[#allocation12_spill] sm:$0xff] %v1317_v53  ;;  %v282_v4 = vmul.f32 0.3275911, %v1317_v53  ;;  %1013 = vpow2.f32 %v754_v52  ;;  %v406_v25 = vsub.f32 1.0, %v405_v46  ;;  %v1355_v27 = vmul.f32 %v699_v59, %v1264_v5 }
  0xa6   :  { %2086 = vst [vmem:[#allocation13_spill] sm:$0xff] %v1324_v0  ;;  %v290_v21 = vmul.f32 0.3275911, %v274_v9  ;;  %1015 = vpow2.f32 %v744_v2  ;;  %v756_v30 = vmul.f32 1.442695, %v727_v3  ;;  %v706_v34 = vsub.f32 0.0, %v274_v9  ;;  %v229_v5 = vpop.f32.mrf.mxu2 }
  0xa7   :  { %v1339_v11 = vpop.eup %1005  ;;  %v1346_v17 = vadd.f32 1.0, %v282_v4  ;;  %2091 = vst [vmem:[#allocation18_spill] sm:$0xff] %v1355_v27  ;;  %v296_v35 = vmul.f32 0.3275911, %v280_v23  ;;  %v496_v37 = vsub.f32 1.0, %v495_v13  ;;  %v1364_v38 = vmul.f32 0.5, %v1266_v6  ;;  %v247_v52 = vpop.f32.mrf.mxu3 }
  0xa8   :  { %v1352_v24 = vpop.eup %1007  ;;  %v420_v32 = vmul.f32 %v1339_v11, %v1294_v29  ;;  %v1361_v33 = vadd.f32 1.0, %v290_v21  ;;  %v1367_v39 = vmul.f32 0.5, %v1268_v7  ;;  %v331_v46 = vsub.f32 1.0, %v330_v55  ;;  %v214_v21 = vpop.f32.mrf.mxu0 }
  0xa9   :  { %2089 = vst [vmem:[#allocation16_spill] sm:$0xff] %v1346_v17  ;;  %v1357_v57 = vpop.eup %1009  ;;  %1017 = vrcp.f32 %v1346_v17  ;;  %v716_v2 = vmul.f32 %v700_v19, %v1292_v28  ;;  %v1374_v3 = vadd.f32 1.0, %v296_v35  ;;  %v1379_v6 = vmul.f32 %v1307_v44, %v406_v25 }
  0xaa   :  { %2090 = vst [vmem:[#allocation17_spill] sm:$0xff] %v1352_v24  ;;  %v1370_v59 = vpop.eup %1011  ;;  %1019 = vrcp.f32 %v1361_v33  ;;  %v510_v7 = vmul.f32 %v1357_v57, %v1300_v36  ;;  %v1384_v13 = vadd.f32 %v211_v54, %v1260_v1  ;;  %v421_v55 = vsub.f32 1.0, %v420_v32 }
  0xab   :  { %2092 = vst [vmem:[#allocation19_spill] sm:$0xff] %v1364_v38  ;;  %v1376_v4 = vpop.eup %1013  ;;  %1021 = vpow2.f32 %v756_v30  ;;  %v722_v31 = vmul.f32 %v706_v34, %v274_v9  ;;  %v230_v28 = vadd.f32 %v229_v5, %v1240_v49  ;;  %v248_v19 = vadd.f32 %v247_v52, %v1234_v43 }
  0xac   :  { %2093 = vst [vmem:[#allocation20_spill] sm:$0xff] %v1370_v59  ;;  %v1388_v35 = vpop.eup %1015  ;;  %v1391_v40 = vmul.f32 %v1319_v56, %v496_v37  ;;  %v345_v25 = vmul.f32 %v1370_v59, %v1309_v45  ;;  %1023 = vrcp.f32 %v1374_v3  ;;  %v1397_v1 = vmul.f32 0.70710677, %v1384_v13 }
  0xad   :  { %2094 = vst [vmem:[#allocation21_spill] sm:$0xff] %v1384_v13  ;;  %v1400_v54 = vmul.f32 %v1326_v50, %v331_v46  ;;  %v1402_v9 = vmul.f32 1.442695, %v716_v2  ;;  %v712_v49 = vsub.f32 0.0, %v280_v23  ;;  %v1404_v43 = vmul.f32 0.70710677, %v230_v28 }
  0xae   :  { %2095 = vst [vmem:[#allocation22_spill] sm:$0xff] %v1388_v35  ;;  %v1410_v34 = vmul.f32 0.5, %v1311_v47  ;;  %v269_v37 = vand.u32 2147483647, %v1397_v1  ;;  %v1413_v5 = vmul.f32 0.70710677, %v248_v19  ;;  %v1418_v46 = vmul.f32 %v1339_v11, %v421_v55 }
  0xaf   :  { %2096 = vst [vmem:[#allocation23_spill] sm:$0xff] %v1397_v1  ;;  %v1406_v30 = vpop.eup %1017  ;;  %v511_v2 = vsub.f32 1.0, %v510_v7  ;;  %v746_v61 = vmul.f32 1.442695, %v722_v31  ;;  %v275_v63 = vand.u32 2147483647, %v1404_v43  ;;  %v728_v53 = vmul.f32 %v712_v49, %v280_v23 }
  0xb0   :  { %2097 = vst [vmem:[#allocation24_spill] sm:$0xff] %v1400_v54  ;;  %v1415_v52 = vpop.eup %1019  ;;  %v346_v22 = vsub.f32 1.0, %v345_v25  ;;  %v285_v32 = vmul.f32 0.3275911, %v269_v37  ;;  %v701_v13 = vsub.f32 0.0, %v269_v37  ;;  %v315_v1 = vmul.f32 %v1406_v30, %v1346_v17 }
  0xb1   :  { %2098 = vst [vmem:[#allocation25_spill] sm:$0xff] %v1402_v9  ;;  %v1421_v18 = vpop.eup %1021  ;;  %v281_v47 = vand.u32 2147483647, %v1413_v5  ;;  %v291_v9 = vmul.f32 0.3275911, %v275_v63  ;;  %v707_v27 = vsub.f32 0.0, %v275_v63  ;;  %v435_v31 = vmul.f32 %v1415_v52, %v1361_v33 }
  0xb2   :  { %2099 = vst [vmem:[#allocation26_spill] sm:$0xff] %v1406_v30  ;;  %v1426_v8 = vpop.eup %1023  ;;  %v1430_v7 = vadd.f32 1.0, %v285_v32  ;;  %v717_v55 = vmul.f32 %v701_v13, %v269_v37  ;;  %1025 = vpow2.f32 %v746_v61  ;;  %v1437_v23 = vmul.f32 %v1357_v57, %v511_v2  ;;  %v232_v13 = vpop.f32.mrf.mxu2 }
  0xb3   :  { %2100 = vst [vmem:[#allocation27_spill] sm:$0xff] %v1410_v34  ;;  %v297_v38 = vmul.f32 0.3275911, %v281_v47  ;;  %v525_v25 = vmul.f32 %v1426_v8, %v1374_v3  ;;  %v1434_v50 = vadd.f32 1.0, %v291_v9  ;;  %v713_v54 = vsub.f32 0.0, %v281_v47  ;;  %v217_v32 = vpop.f32.mrf.mxu0 }
  0xb4   :  { %2101 = vst [vmem:[#allocation28_spill] sm:$0xff] %v1430_v7  ;;  %v1440_v49 = vmul.f32 %v1370_v59, %v346_v22  ;;  %v1443_v24 = vmul.f32 0.5, %v1314_v51  ;;  %1027 = vrcp.f32 %v1430_v7  ;;  %v316_v61 = vsub.f32 1.0, %v315_v1 }
  0xb5   :  { %v758_v37 = vmul.f32 1.442695, %v728_v53  ;;  %1029 = vrcp.f32 %v1434_v50  ;;  %v723_v9 = vmul.f32 %v707_v27, %v275_v63  ;;  %v436_v17 = vsub.f32 1.0, %v435_v31 }
  0xb6   :  { %2102 = vst [vmem:[#allocation29_spill] sm:$0xff] %v1440_v49  ;;  %v736_v34 = vmul.f32 1.442695, %v717_v55  ;;  %v1447_v35 = vadd.f32 1.0, %v297_v38  ;;  %v1450_v2 = vadd.f32 %v214_v21, %v1238_v48  ;;  %v526_v22 = vsub.f32 1.0, %v525_v25 }
  0xb7   :  { %v729_v60 = vmul.f32 %v713_v54, %v281_v47  ;;  %v233_v51 = vadd.f32 %v232_v13, %v1232_v42  ;;  %v218_v59 = vadd.f32 %v217_v32, %v1246_v58  ;;  %v1454_v49 = vmul.f32 0.5, %v230_v28 }
  0xb8   :  { %2103 = vst [vmem:[#allocation30_spill] sm:$0xff] %v1450_v2  ;;  %1031 = vrcp.f32 %v1447_v35  ;;  %v1457_v53 = vmul.f32 0.5, %v248_v19  ;;  %v1460_v63 = vmul.f32 0.70710677, %v1450_v2  ;;  %v1462_v27 = vpop.eup %1025  ;;  %v748_v48 = vmul.f32 1.442695, %v723_v9 }
  0xb9   :  { %2104 = vst [vmem:[#allocation31_spill] sm:$0xff] %v1454_v49  ;;  %1033 = vpow2.f32 %v758_v37  ;;  %v1464_v38 = vmul.f32 0.70710677, %v233_v51  ;;  %v1466_v21 = vmul.f32 0.70710677, %v218_v59  ;;  %v1471_v58 = vmul.f32 %v1406_v30, %v316_v61 }
  0xba   :  { %2105 = vst [vmem:[#allocation32_spill] sm:$0xff] %v1460_v63  ;;  %v1468_v42 = vpop.eup %1027  ;;  %v1474_v28 = vmul.f32 %v1415_v52, %v436_v17  ;;  %1035 = vpow2.f32 %v736_v34  ;;  %v270_v19 = vand.u32 2147483647, %v1460_v63  ;;  %v527_v54 = vmul.f32 %v1426_v8, %v526_v22  ;;  %v235_v12 = vpop.f32.mrf.mxu2 }
  0xbb   :  { %2106 = vst [vmem:[#allocation33_spill] sm:$0xff] %v1462_v27  ;;  %v1477_v1 = vpop.eup %1029  ;;  %v760_v47 = vmul.f32 1.442695, %v729_v60  ;;  %v276_v31 = vand.u32 2147483647, %v1464_v38  ;;  %v360_v25 = vmul.f32 %v1468_v42, %v1430_v7  ;;  %vm529_vm1 = vweird.f32 %v1374_v3 }
  0xbc   :  { %2107 = vst [vmem:[#allocation34_spill] sm:$0xff] %v1466_v21  ;;  %v271_v55 = vand.u32 2147483647, %v1466_v21  ;;  %v450_v13 = vmul.f32 %v1477_v1, %v1434_v50  ;;  %v286_v17 = vmul.f32 0.3275911, %v270_v19  ;;  %v702_v32 = vsub.f32 0.0, %v270_v19 }
  0xbd   :  { %2108 = vst [vmem:[#allocation35_spill] sm:$0xff] %v1468_v42  ;;  %1037 = vpow2.f32 %v748_v48  ;;  %vm544_vm2 = vweird.f32 %v1447_v35  ;;  %v292_v34 = vmul.f32 0.3275911, %v276_v31  ;;  %v708_v61 = vsub.f32 0.0, %v276_v31 }
  0xbe   :  { %2109 = vst [vmem:[#allocation36_spill] sm:$0xff] %v1471_v58  ;;  %v1032_v60 = vpop.eup %1031  ;;  %v1488_v37 = vadd.f32 1.0, %v286_v17  ;;  %v718_v9 = vmul.f32 %v702_v32, %v270_v19  ;;  %v287_v22 = vmul.f32 0.3275911, %v271_v55  ;;  %v703_v2 = vsub.f32 0.0, %v271_v55 }
  0xbf   :  { %v1490_v63 = vpop.eup %1033  ;;  %v540_v30 = vmul.f32 %v1032_v60, %v1447_v35  ;;  %1039 = vpow2.f32 %v760_v47  ;;  %v1493_v58 = vadd.f32 1.0, %v292_v34  ;;  %v724_v21 = vmul.f32 %v708_v61, %v276_v31 }
  0xc0   :  { %v1495_v48 = vpop.eup %1035  ;;  %v361_v49 = vsub.f32 1.0, %v360_v25  ;;  %v451_v26 = vsub.f32 1.0, %v450_v13  ;;  %1041 = vrcp.f32 %v1488_v37  ;;  %v738_v17 = vmul.f32 1.442695, %v718_v9 }
  0xc1   :  { %2110 = vst [vmem:[#allocation37_spill] sm:$0xff] %v1495_v48  ;;  %v541_v27 = vsub.f32 1.0, %v540_v30  ;;  %1043 = vrcp.f32 %v1493_v58  ;;  %v750_v19 = vmul.f32 1.442695, %v724_v21  ;;  %v1499_v32 = vmul.f32 0.5, %v233_v51 }
  0xc2   :  { %v1501_v0 = vadd.f32 1.0, %v287_v22  ;;  %v719_v47 = vmul.f32 %v703_v2, %v271_v55  ;;  %v1503_v34 = vmul.f32 0.5, %v218_v59  ;;  %v236_v31 = vadd.f32 %v235_v12, %v1230_v41 }
  0xc3   :  { %v1506_v61 = vpop.eup %1037  ;;  %v542_v25 = vmul.f32 %v1032_v60, %v541_v27  ;;  %1045 = vpow2.f32 %v738_v17  ;;  %vm545_vm3 = vweird.f32 %v1032_v60  ;;  %v548_v13 = vand.u32 2147483647, %v1447_v35 }
  0xc4   :  { %2111 = vst [vmem:[#allocation38_spill] sm:$0xff] %v1503_v34  ;;  %vm514_vm4 = vweird.f32 %v1300_v36  ;;  %v1511_v30 = vmul.f32 %v1468_v42, %v361_v49  ;;  %v1514_v51 = vmul.f32 %v1477_v1, %v451_v26  ;;  %1047 = vrcp.f32 %v1501_v0  ;;  %vm1531_vm6 = vmor %vm544_vm2, %vm545_vm3 }
  0xc5   :  { %2112 = vst [vmem:[#allocation39_spill] sm:$0xff] %v1506_v61  ;;  %v1517_v59 = vmul.f32 0.70710677, %v236_v31  ;;  %v1519_v41 = vpop.eup %1039  ;;  %1049 = vpow2.f32 %v750_v19  ;;  %v740_v12 = vmul.f32 1.442695, %v719_v47  ;;  %v543_v2 = vadd.f32 %v1032_v60, %v542_v25 }
  0xc6   :  { %2113 = vst [vmem:[#allocation40_spill] sm:$0xff] %v1511_v30  ;;  %v550_v27 = vand.u32 2147483648, %v1447_v35  ;;  %v1522_v21 = vpop.eup %1041  ;;  %v1526_v55 = vmul.f32 0.5, %v236_v31  ;;  %vm549_vm7 = vcmp.eq.f32.partialorder %v548_v13, 8.507059e+37  ;;  %v528_v9 = vadd.f32 %v1426_v8, %v527_v54 }
  0xc7   :  { %v277_v49 = vand.u32 2147483647, %v1517_v59  ;;  %v1536_v22 = vpop.eup %1043  ;;  %v375_v17 = vmul.f32 %v1522_v21, %v1488_v37  ;;  %v547_v19 = vsel %vm1531_vm6, %v1032_v60, %v543_v2  ;;  %vm530_vm8 = vweird.f32 %v1426_v8 }
  0xc8   :  { %v551_v47 = vor.u32 1.1754944e-38, %v550_v27  ;;  %v465_v35 = vmul.f32 %v1536_v22, %v1493_v58  ;;  %vm1547_vm9 = vmor %vm529_vm1, %vm530_vm8  ;;  %v533_v13 = vand.u32 2147483647, %v1374_v3  ;;  %v535_v27 = vand.u32 2147483648, %v1374_v3 }
  0xc9   :  { %v293_v31 = vmul.f32 0.3275911, %v277_v49  ;;  %v709_v25 = vsub.f32 0.0, %v277_v49  ;;  %v1552_v48 = vpop.eup %1045  ;;  %v376_v26 = vsub.f32 1.0, %v375_v17  ;;  %v532_v2 = vsel %vm1547_vm9, %v1426_v8, %v528_v9 }
  0xca   :  { %2118 = vst [vmem:[#allocation41_spill] sm:$0xff] %v1552_v48  ;;  %v1554_v60 = vsel %vm549_vm7, %v551_v47, %v547_v19  ;;  %v1560_v34 = vpop.eup %1047  ;;  %v466_v42 = vsub.f32 1.0, %v465_v35  ;;  %1051 = vpow2.f32 %v740_v12  ;;  %v536_v8 = vor.u32 1.1754944e-38, %v535_v27 }
  0xcb   :  { %v1562_v30 = vadd.f32 1.0, %v293_v31  ;;  %v725_v45 = vmul.f32 %v709_v25, %v277_v49  ;;  %v569_v61 = vmul.f32 1.0614054, %v1554_v60  ;;  %v1565_v7 = vpop.eup %1049  ;;  %v1568_v17 = vmul.f32 %v1522_v21, %v376_v26 }
  0xcc   :  { %v390_v19 = vmul.f32 %v1560_v34, %v1501_v0  ;;  %v467_v3 = vmul.f32 %v1536_v22, %v466_v42  ;;  %vm534_vm10 = vcmp.eq.f32.partialorder %v533_v13, 8.507059e+37  ;;  %v513_v31 = vadd.f32 %v1357_v57, %v1437_v23 }
  0xcd   :  { %1053 = vrcp.f32 %v1562_v30  ;;  %v752_v9 = vmul.f32 1.442695, %v725_v45  ;;  %v585_v49 = vadd.f32 -1.4531521, %v569_v61  ;;  %v1574_v35 = vsel %vm534_vm10, %v536_v8, %v532_v2 }
  0xce   :  { %v391_v47 = vsub.f32 1.0, %v390_v19  ;;  %v568_v25 = vmul.f32 1.0614054, %v1574_v35  ;;  %vm515_vm11 = vweird.f32 %v1357_v57  ;;  %v518_v12 = vand.u32 2147483647, %v1300_v36 }
  0xcf   :  { %1055 = vpow2.f32 %v752_v9  ;;  %vm469_vm12 = vweird.f32 %v1493_v58  ;;  %v601_v45 = vmul.f32 %v585_v49, %v1554_v60  ;;  %vm1588_vm13 = vmor %vm514_vm4, %vm515_vm11  ;;  %v520_v23 = vand.u32 2147483648, %v1300_v36 }
  0xd0   :  { %v1583_v42 = vmul.f32 %v1560_v34, %v391_v47  ;;  %v498_v54 = vadd.f32 %v1319_v56, %v1391_v40  ;;  %v584_v13 = vadd.f32 -1.4531521, %v568_v25  ;;  %v517_v26 = vsel %vm1588_vm13, %v1357_v57, %v513_v31  ;;  %v1603_v27 = vpop.eup %1051 }
  0xd1   :  { %vm1598_vm14 = vcmp.eq.f32.partialorder %v518_v12, 8.507059e+37  ;;  %vm500_vm15 = vweird.f32 %v1319_v56  ;;  %2123 = vst [vmem:[#allocation42_spill] sm:$0xff] %v1603_v27  ;;  %vm484_vm0 = vweird.f32 %v1562_v30  ;;  %v617_v19 = vadd.f32 1.4214138, %v601_v45 }
  0xd2   :  { %v521_v36 = vor.u32 1.1754944e-38, %v520_v23  ;;  %vm1608_vm1 = vmor %vm499_vm5, %vm500_vm15  ;;  %v503_v57 = vand.u32 2147483647, %v1283_v20  ;;  %v505_v8 = vand.u32 2147483648, %v1283_v20  ;;  %v600_v47 = vmul.f32 %v584_v13, %v1574_v35 }
  0xd3   :  { %v1054_v9 = vpop.eup %1053  ;;  %v502_v49 = vsel %vm1608_vm1, %v1319_v56, %v498_v54  ;;  %v488_v31 = vand.u32 2147483647, %v1562_v30  ;;  %v490_v25 = vand.u32 2147483648, %v1562_v30  ;;  %v633_v45 = vmul.f32 %v617_v19, %v1554_v60 }
  0xd4   :  { %v480_v12 = vmul.f32 %v1054_v9, %v1562_v30  ;;  %v1624_v61 = vsel %vm1598_vm14, %v521_v36, %v517_v26  ;;  %vm504_vm2 = vcmp.eq.f32.partialorder %v503_v57, 8.507059e+37  ;;  %v616_v23 = vadd.f32 1.4214138, %v600_v47 }
  0xd5   :  { %v1626_v20 = vpop.eup %1055  ;;  %v567_v13 = vmul.f32 1.0614054, %v1624_v61  ;;  %v506_v40 = vor.u32 1.1754944e-38, %v505_v8  ;;  %vm485_vm3 = vweird.f32 %v1054_v9  ;;  %v649_v54 = vadd.f32 -0.28449672, %v633_v45 }
  0xd6   :  { %v481_v56 = vsub.f32 1.0, %v480_v12  ;;  %vm1629_vm4 = vcmp.eq.f32.partialorder %v488_v31, 8.507059e+37  ;;  %v491_v27 = vor.u32 1.1754944e-38, %v490_v25  ;;  %vm454_vm5 = vweird.f32 %v1434_v50  ;;  %vm486_vm9 = vmor %vm484_vm0, %vm485_vm3 }
  0xd7   :  { %v632_v26 = vmul.f32 %v616_v23, %v1574_v35  ;;  %v583_v2 = vadd.f32 -1.4531521, %v567_v13  ;;  %v1635_v19 = vsel %vm504_vm2, %v506_v40, %v502_v49  ;;  %vm470_vm6 = vweird.f32 %v1536_v22 }
  0xd8   :  { %v482_v36 = vmul.f32 %v1054_v9, %v481_v56  ;;  %v665_v57 = vmul.f32 %v649_v54, %v1554_v60  ;;  %v566_v8 = vmul.f32 1.0614054, %v1635_v19  ;;  %v468_v47 = vadd.f32 %v1536_v22, %v467_v3  ;;  %vm1644_vm7 = vmor %vm469_vm12, %vm470_vm6 }
  0xd9   :  { %v648_v31 = vadd.f32 -0.28449672, %v632_v26  ;;  %v599_v12 = vmul.f32 %v583_v2, %v1624_v61  ;;  %v473_v49 = vand.u32 2147483647, %v1493_v58  ;;  %v475_v45 = vand.u32 2147483648, %v1493_v58 }
  0xda   :  { %v681_v23 = vadd.f32 0.2548296, %v665_v57  ;;  %v582_v13 = vadd.f32 -1.4531521, %v566_v8  ;;  %v483_v40 = vadd.f32 %v1054_v9, %v482_v36  ;;  %v472_v3 = vsel %vm1644_vm7, %v1536_v22, %v468_v47 }
  0xdb   :  { %vm809_vm8 = vcmp.ge.f32.partialorder %v1413_v5, 0.0  ;;  %v664_v56 = vmul.f32 %v648_v31, %v1574_v35  ;;  %v615_v54 = vadd.f32 1.4214138, %v599_v12  ;;  %vm474_vm10 = vcmp.eq.f32.partialorder %v473_v49, 8.507059e+37 }
  0xdc   :  { %v476_v26 = vor.u32 1.1754944e-38, %v475_v45  ;;  %v697_v58 = vmul.f32 %v681_v23, %v1554_v60  ;;  %v598_v2 = vmul.f32 %v582_v13, %v1635_v19  ;;  %v487_v36 = vsel %vm486_vm9, %v1054_v9, %v483_v40 }
  0xdd   :  { %v453_v57 = vadd.f32 %v1477_v1, %v1514_v51  ;;  %v680_v22 = vadd.f32 0.2548296, %v664_v56  ;;  %v631_v8 = vmul.f32 %v615_v54, %v1624_v61  ;;  %v1665_v47 = vsel %vm1629_vm4, %v491_v27, %v487_v36 }
  0xde   :  { %v1667_v31 = vsel %vm474_vm10, %v476_v26, %v472_v3  ;;  %vm808_vm11 = vcmp.ge.f32.partialorder %v1337_v10, 0.0  ;;  %v777_v30 = vmul.f32 %v1519_v41, %v697_v58  ;;  %v614_v60 = vadd.f32 1.4214138, %v598_v2 }
  0xdf   :  { %v565_v12 = vmul.f32 1.0614054, %v1665_v47  ;;  %v564_v9 = vmul.f32 1.0614054, %v1667_v31  ;;  %vm439_vm12 = vweird.f32 %v1361_v33  ;;  %v696_v51 = vmul.f32 %v680_v22, %v1574_v35 }
  0xe0   :  { %v647_v25 = vadd.f32 -0.28449672, %v631_v8  ;;  %vm455_vm13 = vweird.f32 %v1477_v1  ;;  %v458_v48 = vand.u32 2147483647, %v1434_v50  ;;  %v793_v27 = vsub.f32 1.0, %v777_v30 }
  0xe1   :  { %v630_v49 = vmul.f32 %v614_v60, %v1635_v19  ;;  %v581_v45 = vadd.f32 -1.4531521, %v565_v12  ;;  %v580_v23 = vadd.f32 -1.4531521, %v564_v9  ;;  %vm1680_vm14 = vmor %vm454_vm5, %vm455_vm13  ;;  %v776_v13 = vmul.f32 %v1490_v63, %v696_v51 }
  0xe2   :  { %v663_v35 = vmul.f32 %v647_v25, %v1624_v61  ;;  %v457_v40 = vsel %vm1680_vm14, %v1477_v1, %v453_v57  ;;  %vm1689_vm15 = vcmp.eq.f32.partialorder %v458_v48, 8.507059e+37  ;;  %v825_v56 = vsub.f32 0.0, %v793_v27 }
  0xe3   :  { %v646_v54 = vadd.f32 -0.28449672, %v630_v49  ;;  %v597_v26 = vmul.f32 %v581_v45, %v1665_v47  ;;  %v596_v58 = vmul.f32 %v580_v23, %v1667_v31  ;;  %v792_v2 = vsub.f32 1.0, %v776_v13 }
  0xe4   :  { %v679_v36 = vadd.f32 0.2548296, %v663_v35  ;;  %v460_v63 = vand.u32 2147483648, %v1434_v50  ;;  %v438_v22 = vadd.f32 %v1415_v52, %v1474_v28  ;;  %vm807_vm0 = vcmp.ge.f32.partialorder %v1275_v15, 0.0 }
  0xe5   :  { %v841_v1 = vsel %vm809_vm8, %v793_v27, %v825_v56  ;;  %v662_v57 = vmul.f32 %v646_v54, %v1635_v19  ;;  %v613_v8 = vadd.f32 1.4214138, %v597_v26  ;;  %v612_v30 = vadd.f32 1.4214138, %v596_v58 }
  0xe6   :  { %vm424_vm1 = vweird.f32 %v1294_v29  ;;  %v873_v60 = vadd.f32 1.0, %v841_v1  ;;  %v824_v12 = vsub.f32 0.0, %v792_v2  ;;  %v695_v9 = vmul.f32 %v679_v36, %v1624_v61 }
  0xe7   :  { %v461_v51 = vor.u32 1.1754944e-38, %v460_v63  ;;  %v678_v50 = vadd.f32 0.2548296, %v662_v57  ;;  %v629_v25 = vmul.f32 %v613_v8, %v1665_v47  ;;  %v628_v28 = vmul.f32 %v612_v30, %v1667_v31 }
  0xe8   :  { %vm440_vm2 = vweird.f32 %v1415_v52  ;;  %vm806_vm3 = vcmp.ge.f32.partialorder %v1254_v62, 0.0  ;;  %v889_v5 = vmul.f32 %v873_v60, %v1457_v53  ;;  %v840_v48 = vsel %vm808_vm11, %v792_v2, %v824_v12 }
  0xe9   :  { %v775_v27 = vmul.f32 %v1421_v18, %v695_v9  ;;  %v1714_v61 = vsel %vm1689_vm15, %v461_v51, %v457_v40  ;;  %v872_v49 = vadd.f32 1.0, %v840_v48  ;;  %v694_v45 = vmul.f32 %v678_v50, %v1635_v19  ;;  %vm1719_vm4 = vmor %vm439_vm12, %vm440_vm2 }
  0xea   :  { %v645_v23 = vadd.f32 -0.28449672, %v629_v25  ;;  %v644_v41 = vadd.f32 -0.28449672, %v628_v28  ;;  %918 = vmatpush.msra.mxu1 %v889_v5  ;;  %979 = vmatpush.msrb.mxu3 %v889_v5  ;;  %v563_v18 = vmul.f32 1.0614054, %v1714_v61  ;;  %v442_v53 = vsel %vm1719_vm4, %v1415_v52, %v438_v22 }
  0xeb   :  { %v791_v10 = vsub.f32 1.0, %v775_v27  ;;  %v443_v35 = vand.u32 2147483647, %v1361_v33  ;;  %v888_v19 = vmul.f32 %v872_v49, %v1443_v24  ;;  %v774_v40 = vmul.f32 %v1376_v4, %v694_v45 }
  0xec   :  { %v661_v3 = vmul.f32 %v645_v23, %v1665_v47  ;;  %v660_v56 = vmul.f32 %v644_v41, %v1667_v31  ;;  %vm409_vm5 = vweird.f32 %v1277_v16  ;;  %v579_v26 = vadd.f32 -1.4531521, %v563_v18 }
  0xed   :  { %v823_v54 = vsub.f32 0.0, %v791_v10  ;;  %vm1733_vm6 = vcmp.eq.f32.partialorder %v443_v35, 8.507059e+37  ;;  %v445_v52 = vand.u32 2147483648, %v1361_v33  ;;  %919 = vmatpush.msra.mxu1 %v888_v19  ;;  %980 = vmatpush.msrb.mxu3 %v888_v19  ;;  %v790_v2 = vsub.f32 1.0, %v774_v40 }
  0xee   :  { %v677_v24 = vadd.f32 0.2548296, %v661_v3  ;;  %v676_v36 = vadd.f32 0.2548296, %v660_v56  ;;  %v423_v4 = vadd.f32 %v1339_v11, %v1418_v46  ;;  %vm804_vm7 = vcmp.ge.f32.partialorder %v1464_v38, 0.0 }
  0xef   :  { %vm805_vm8 = vcmp.ge.f32.partialorder %v1517_v59, 0.0  ;;  %v839_v63 = vsel %vm807_vm0, %v791_v10, %v823_v54  ;;  %v595_v22 = vmul.f32 %v579_v26, %v1714_v61  ;;  %v446_v1 = vor.u32 1.1754944e-38, %v445_v52 }
  0xf0   :  { %vm425_vm9 = vweird.f32 %v1339_v11  ;;  %v871_v33 = vadd.f32 1.0, %v839_v63  ;;  %v822_v57 = vsub.f32 0.0, %v790_v2  ;;  %v693_v8 = vmul.f32 %v677_v24, %v1665_v47 }
  0xf1   :  { %v692_v30 = vmul.f32 %v676_v36, %v1667_v31  ;;  %vm1750_vm10 = vmor %vm424_vm1, %vm425_vm9  ;;  %v611_v60 = vadd.f32 1.4214138, %v595_v22  ;;  %v1756_v15 = vsel %vm1733_vm6, %v446_v1, %v442_v53  ;;  %v428_v9 = vand.u32 2147483647, %v1294_v29 }
  0xf2   :  { %v427_v12 = vsel %vm1750_vm10, %v1339_v11, %v423_v4  ;;  %vm394_vm11 = vweird.f32 %v1501_v0  ;;  %v887_v47 = vmul.f32 %v871_v33, %v1367_v39  ;;  %v838_v31 = vsel %vm806_vm3, %v790_v2, %v822_v57  ;;  %v2149_v4 = vld [vmem:[#allocation39_spill] sm:$0xff] }
  0xf3   :  { %v773_v51 = vmul.f32 %v1626_v20, %v693_v8  ;;  %v772_v50 = vmul.f32 %v1565_v7, %v692_v30  ;;  %v870_v25 = vadd.f32 1.0, %v838_v31  ;;  %v627_v28 = vmul.f32 %v611_v60, %v1714_v61 }
  0xf4   :  { %v562_v5 = vmul.f32 1.0614054, %v1756_v15  ;;  %vm1770_vm12 = vcmp.eq.f32.partialorder %v428_v9, 8.507059e+37  ;;  %920 = vmatpush.msra.mxu1 %v887_v47  ;;  %981 = vmatpush.msrb.mxu3 %v887_v47  ;;  %v430_v62 = vand.u32 2147483648, %v1294_v29  ;;  %v408_v20 = vadd.f32 %v1307_v44, %v1379_v6  ;;  %v2152_v9 = vld [vmem:[#allocation11_spill] sm:$0xff] }
  0xf5   :  { %v789_v48 = vsub.f32 1.0, %v773_v51  ;;  %v788_v39 = vsub.f32 1.0, %v772_v50  ;;  %v886_v7 = vmul.f32 %v870_v25, %v1344_v14  ;;  %v643_v27 = vadd.f32 -0.28449672, %v627_v28 }
  0xf6   :  { %v578_v49 = vadd.f32 -1.4531521, %v562_v5  ;;  %vm410_vm13 = vweird.f32 %v1307_v44  ;;  %v431_v41 = vor.u32 1.1754944e-38, %v430_v62  ;;  %v413_v29 = vand.u32 2147483647, %v1277_v16 }
  0xf7   :  { %v821_v45 = vsub.f32 0.0, %v789_v48  ;;  %v820_v23 = vsub.f32 0.0, %v788_v39  ;;  %vm1781_vm14 = vmor %vm409_vm5, %vm410_vm13  ;;  %921 = vmatpush.msra.mxu1 %v886_v7  ;;  %982 = vmatpush.msrb.mxu3 %v886_v7  ;;  %v659_v6 = vmul.f32 %v643_v27, %v1714_v61  ;;  %v415_v18 = vand.u32 2147483648, %v1277_v16 }
  0xf8   :  { %v594_v14 = vmul.f32 %v578_v49, %v1756_v15  ;;  %v412_v10 = vsel %vm1781_vm14, %v1307_v44, %v408_v20  ;;  %vm379_vm15 = vweird.f32 %v1488_v37  ;;  %v1799_v19 = vsel %vm1770_vm12, %v431_v41, %v427_v12  ;;  %v2156_v49 = vld [vmem:[#allocation40_spill] sm:$0xff] }
  0xf9   :  { %v837_v53 = vsel %vm805_vm8, %v789_v48, %v821_v45  ;;  %v836_v35 = vsel %vm804_vm7, %v788_v39, %v820_v23  ;;  %vm1801_vm0 = vcmp.eq.f32.partialorder %v413_v29, 8.507059e+37  ;;  %v675_v56 = vadd.f32 0.2548296, %v659_v6  ;;  %v2157_v45 = vld [vmem:[#allocation35_spill] sm:$0xff]  ;;  %v2158_v6 = vld [vmem:[#allocation33_spill] sm:$0xff] }
  0xfa   :  { %v869_v3 = vadd.f32 1.0, %v837_v53  ;;  %v868_v44 = vadd.f32 1.0, %v836_v35  ;;  %v610_v16 = vadd.f32 1.4214138, %v594_v14  ;;  %vm803_vm1 = vcmp.ge.f32.partialorder %v1404_v43, 0.0 }
  0xfb   :  { %v561_v59 = vmul.f32 1.0614054, %v1799_v19  ;;  %v416_v54 = vor.u32 1.1754944e-38, %v415_v18  ;;  %v393_v38 = vadd.f32 %v1560_v34, %v1583_v42  ;;  %vm395_vm2 = vweird.f32 %v1560_v34 }
  0xfc   :  { %v885_v26 = vmul.f32 %v869_v3, %v1526_v55  ;;  %v884_v58 = vmul.f32 %v868_v44, %v1499_v32  ;;  %v691_v52 = vmul.f32 %v675_v56, %v1714_v61  ;;  %v626_v2 = vmul.f32 %v610_v16, %v1756_v15  ;;  %vm1816_vm3 = vmor %vm394_vm11, %vm395_vm2  ;;  %v2148_v61 = vld [vmem:[#allocation28_spill] sm:$0xff] }
  0xfd   :  { %v577_v36 = vadd.f32 -1.4531521, %v561_v59  ;;  %v1822_v42 = vsel %vm1801_vm0, %v416_v54, %v412_v10  ;;  %v397_v55 = vsel %vm1816_vm3, %v1560_v34, %v393_v38  ;;  %v398_v32 = vand.u32 2147483647, %v1501_v0  ;;  %v2160_v10 = vld [vmem:[#allocation31_spill] sm:$0xff] }
  0xfe   :  { %vm364_vm4 = vweird.f32 %v2148_v61  ;;  %922 = vmatpush.msra.mxu1 %v885_v26  ;;  %983 = vmatpush.msrb.mxu3 %v885_v26  ;;  %v771_v63 = vmul.f32 %v2149_v4, %v691_v52  ;;  %v642_v22 = vadd.f32 -0.28449672, %v626_v2  ;;  %v560_v1 = vmul.f32 1.0614054, %v1822_v42  ;;  %v2165_v52 = vld [vmem:[#allocation5_spill] sm:$0xff]  ;;  %v2185_v26 = vld [vmem:[#allocation19_spill] sm:$0xff] }
  0xff   :  { %v400_v33 = vand.u32 2147483648, %v1501_v0  ;;  %v593_v57 = vmul.f32 %v577_v36, %v1799_v19  ;;  %vm1833_vm5 = vcmp.eq.f32.partialorder %v398_v32, 8.507059e+37  ;;  %vm380_vm6 = vweird.f32 %v1522_v21  ;;  %v2167_v32 = vld [vmem:[#allocation20_spill] sm:$0xff] }
 0x100   :  { %v383_v34 = vand.u32 2147483647, %v1488_v37  ;;  %923 = vmatpush.msra.mxu1 %v884_v58  ;;  %984 = vmatpush.msrb.mxu3 %v884_v58  ;;  %v787_v30 = vsub.f32 1.0, %v771_v63  ;;  %v658_v46 = vmul.f32 %v642_v22, %v1756_v15  ;;  %v576_v60 = vadd.f32 -1.4531521, %v560_v1  ;;  %vm381_vm9 = vmor %vm379_vm15, %vm380_vm6 }
 0x101   :  { %v401_v12 = vor.u32 1.1754944e-38, %v400_v33  ;;  %vm349_vm7 = vweird.f32 %v2152_v9  ;;  %v609_v0 = vadd.f32 1.4214138, %v593_v57  ;;  %v378_v47 = vadd.f32 %v1522_v21, %v1568_v17  ;;  %v2155_v17 = vld [vmem:[#allocation13_spill] sm:$0xff] }
 0x102   :  { %vm1843_vm8 = vcmp.eq.f32.partialorder %v383_v34, 8.507059e+37  ;;  %v385_v51 = vand.u32 2147483648, %v1488_v37  ;;  %v819_v50 = vsub.f32 0.0, %v787_v30  ;;  %v674_v25 = vadd.f32 0.2548296, %v658_v46  ;;  %v2171_v46 = vld [vmem:[#allocation22_spill] sm:$0xff] }
 0x103   :  { %v592_v28 = vmul.f32 %v576_v60, %v1822_v42  ;;  %v1851_v5 = vsel %vm1833_vm5, %v401_v12, %v397_v55  ;;  %vm802_vm10 = vcmp.ge.f32.partialorder %v2155_v17, 0.0  ;;  %v625_v11 = vmul.f32 %v609_v0, %v1799_v19  ;;  %v2166_v55 = vld [vmem:[#allocation29_spill] sm:$0xff] }
 0x104   :  { %v559_v48 = vmul.f32 1.0614054, %v1851_v5  ;;  %v382_v39 = vsel %vm381_vm9, %v1522_v21, %v378_v47  ;;  %v386_v62 = vor.u32 1.1754944e-38, %v385_v51  ;;  %v835_v20 = vsel %vm803_vm1, %v787_v30, %v819_v50  ;;  %v2170_v30 = vld [vmem:[#allocation2_spill] sm:$0xff] }
 0x105   :  { %v690_v7 = vmul.f32 %v674_v25, %v1756_v15  ;;  %v608_v27 = vadd.f32 1.4214138, %v592_v28  ;;  %v363_v23 = vadd.f32 %v2157_v45, %v2156_v49  ;;  %v867_v37 = vadd.f32 1.0, %v835_v20  ;;  %v2159_v15 = vld [vmem:[#allocation8_spill] sm:$0xff]  ;;  %v2172_v25 = vld [vmem:[#allocation27_spill] sm:$0xff] }
 0x106   :  { %v641_v41 = vadd.f32 -0.28449672, %v625_v11  ;;  %v575_v13 = vadd.f32 -1.4531521, %v559_v48  ;;  %v1868_v29 = vsel %vm1843_vm8, %v386_v62, %v382_v39  ;;  %vm365_vm11 = vweird.f32 %v2157_v45  ;;  %v2175_v39 = vld [vmem:[#allocation16_spill] sm:$0xff] }
 0x107   :  { %v770_v14 = vmul.f32 %v2158_v6, %v690_v7  ;;  %v624_v21 = vmul.f32 %v608_v27, %v1822_v42  ;;  %v558_v43 = vmul.f32 1.0614054, %v1868_v29  ;;  %vm334_vm12 = vweird.f32 %v2159_v15  ;;  %vm1880_vm13 = vmor %vm364_vm4, %vm365_vm11 }
 0x108   :  { %v883_v18 = vmul.f32 %v867_v37, %v2160_v10  ;;  %v657_v53 = vmul.f32 %v641_v41, %v1799_v19  ;;  %v591_v35 = vmul.f32 %v575_v13, %v1851_v5  ;;  %v368_v3 = vand.u32 2147483647, %v2148_v61  ;;  %v2178_v37 = vld [vmem:[#allocation14_spill] sm:$0xff] }
 0x109   :  { %v786_v44 = vsub.f32 1.0, %v770_v14  ;;  %v640_v56 = vadd.f32 -0.28449672, %v624_v21  ;;  %v574_v16 = vadd.f32 -1.4531521, %v558_v43  ;;  %v367_v59 = vsel %vm1880_vm13, %v2157_v45, %v363_v23  ;;  %v2177_v23 = vld [vmem:[#allocation24_spill] sm:$0xff] }
 0x10a   :  { %924 = vmatpush.msra.mxu1 %v883_v18  ;;  %985 = vmatpush.msrb.mxu3 %v883_v18  ;;  %v673_v54 = vadd.f32 0.2548296, %v657_v53  ;;  %v607_v38 = vadd.f32 1.4214138, %v591_v35  ;;  %vm1888_vm14 = vcmp.eq.f32.partialorder %v368_v3, 8.507059e+37  ;;  %v370_v58 = vand.u32 2147483648, %v2148_v61 }
 0x10b   :  { %vm801_vm15 = vcmp.ge.f32.partialorder %v2165_v52, 0.0  ;;  %v818_v2 = vsub.f32 0.0, %v786_v44  ;;  %v656_v24 = vmul.f32 %v640_v56, %v1822_v42  ;;  %v590_v36 = vmul.f32 %v574_v16, %v1868_v29  ;;  %v2179_v13 = vld [vmem:[#allocation34_spill] sm:$0xff] }
 0x10c   :  { %v348_v4 = vadd.f32 %v2167_v32, %v2166_v55  ;;  %v689_v63 = vmul.f32 %v673_v54, %v1799_v19  ;;  %v623_v22 = vmul.f32 %v607_v38, %v1851_v5  ;;  %v371_v1 = vor.u32 1.1754944e-38, %v370_v58  ;;  %v2182_v16 = vld [vmem:[#allocation42_spill] sm:$0xff] }
 0x10d   :  { %vm350_vm0 = vweird.f32 %v2167_v32  ;;  %v834_v61 = vsel %vm802_vm10, %v786_v44, %v818_v2  ;;  %v672_v33 = vadd.f32 0.2548296, %v656_v24  ;;  %v606_v57 = vadd.f32 1.4214138, %v590_v36 }
 0x10e   :  { %vm1905_vm1 = vmor %vm349_vm7, %vm350_vm0  ;;  %v353_v34 = vand.u32 2147483647, %v2152_v9  ;;  %vm800_vm2 = vcmp.ge.f32.partialorder %v2170_v30, 0.0  ;;  %v866_v19 = vadd.f32 1.0, %v834_v61  ;;  %v769_v60 = vmul.f32 %v2171_v46, %v689_v63  ;;  %v2186_v63 = vld [vmem:[#allocation41_spill] sm:$0xff]  ;;  %v2188_v61 = vld [vmem:[#allocation26_spill] sm:$0xff] }
 0x10f   :  { %v639_v12 = vadd.f32 -0.28449672, %v623_v22  ;;  %v1914_v0 = vsel %vm1888_vm14, %v371_v1, %v367_v59  ;;  %v688_v47 = vmul.f32 %v672_v33, %v1822_v42  ;;  %v622_v31 = vmul.f32 %v606_v57, %v1868_v29  ;;  %v2176_v42 = vld [vmem:[#allocation17_spill] sm:$0xff]  ;;  %v2189_v57 = vld [vmem:[#allocation15_spill] sm:$0xff] }
 0x110   :  { %v557_v51 = vmul.f32 1.0614054, %v1914_v0  ;;  %v352_v50 = vsel %vm1905_vm1, %v2167_v32, %v348_v4  ;;  %v882_v28 = vmul.f32 %v866_v19, %v2172_v25  ;;  %v785_v17 = vsub.f32 1.0, %v769_v60 }
 0x111   :  { %v655_v11 = vmul.f32 %v639_v12, %v1851_v5  ;;  %vm1924_vm3 = vcmp.eq.f32.partialorder %v353_v34, 8.507059e+37  ;;  %vm319_vm4 = vweird.f32 %v2175_v39  ;;  %v768_v62 = vmul.f32 %v2176_v42, %v688_v47  ;;  %v2192_v42 = vld [vmem:[#allocation32_spill] sm:$0xff] }
 0x112   :  { %v638_v20 = vadd.f32 -0.28449672, %v622_v31  ;;  %v573_v7 = vadd.f32 -1.4531521, %v557_v51  ;;  %v355_v27 = vand.u32 2147483648, %v2152_v9  ;;  %925 = vmatpush.msra.mxu1 %v882_v28  ;;  %986 = vmatpush.msrb.mxu3 %v882_v28  ;;  %v817_v49 = vsub.f32 0.0, %v785_v17 }
 0x113   :  { %v671_v45 = vadd.f32 0.2548296, %v655_v11  ;;  %v333_v41 = vadd.f32 %v2178_v37, %v2177_v23  ;;  %vm335_vm5 = vweird.f32 %v2178_v37  ;;  %vm799_vm6 = vcmp.ge.f32.partialorder %v2179_v13, 0.0 }
 0x114   :  { %v784_v6 = vsub.f32 1.0, %v768_v62  ;;  %v654_v14 = vmul.f32 %v638_v20, %v1868_v29  ;;  %v589_v21 = vmul.f32 %v573_v7, %v1914_v0  ;;  %v356_v43 = vor.u32 1.1754944e-38, %v355_v27  ;;  %vm1939_vm7 = vmor %vm334_vm12, %vm335_vm5  ;;  %v2193_v7 = vld [vmem:[#allocation38_spill] sm:$0xff] }
 0x115   :  { %v833_v10 = vsel %vm801_vm15, %v785_v17, %v817_v49  ;;  %v687_v18 = vmul.f32 %v671_v45, %v1851_v5  ;;  %v337_v53 = vsel %vm1939_vm7, %v2178_v37, %v333_v41  ;;  %v338_v35 = vand.u32 2147483647, %v2159_v15  ;;  %v2194_v37 = vld [vmem:[#allocation30_spill] sm:$0xff] }
 0x116   :  { %v865_v40 = vadd.f32 1.0, %v833_v10  ;;  %v816_v3 = vsub.f32 0.0, %v784_v6  ;;  %v670_v44 = vadd.f32 0.2548296, %v654_v14  ;;  %v605_v56 = vadd.f32 1.4214138, %v589_v21 }
 0x117   :  { %v767_v59 = vmul.f32 %v2182_v16, %v687_v18  ;;  %v1953_v54 = vsel %vm1924_vm3, %v356_v43, %v352_v50  ;;  %vm1955_vm8 = vcmp.eq.f32.partialorder %v338_v35, 8.507059e+37  ;;  %v340_v5 = vand.u32 2147483648, %v2159_v15  ;;  %v2187_v15 = vld [vmem:[#allocation36_spill] sm:$0xff]  ;;  %v2195_v14 = vld [vmem:[#allocation37_spill] sm:$0xff]  ;;  %v2196_v10 = vld [vmem:[#allocation18_spill] sm:$0xff] }
 0x118   :  { %v881_v58 = vmul.f32 %v865_v40, %v2185_v26  ;;  %v832_v52 = vsel %vm800_vm2, %v784_v6, %v816_v3  ;;  %v686_v2 = vmul.f32 %v670_v44, %v1868_v29  ;;  %v621_v24 = vmul.f32 %v605_v56, %v1914_v0  ;;  %v2197_v40 = vld [vmem:[#allocation25_spill] sm:$0xff]  ;;  %v2198_v56 = vld [vmem:[#allocation12_spill] sm:$0xff] }
 0x119   :  { %v864_v36 = vadd.f32 1.0, %v832_v52  ;;  %v783_v55 = vsub.f32 1.0, %v767_v59  ;;  %v556_v32 = vmul.f32 1.0614054, %v1953_v54  ;;  %v341_v4 = vor.u32 1.1754944e-38, %v340_v5  ;;  %v2200_v52 = vld [vmem:[#allocation23_spill] sm:$0xff] }
 0x11a   :  { %926 = vmatpush.msra.mxu1 %v881_v58  ;;  %987 = vmatpush.msrb.mxu3 %v881_v58  ;;  %v766_v22 = vmul.f32 %v2186_v63, %v686_v2  ;;  %v637_v1 = vadd.f32 -0.28449672, %v621_v24  ;;  %v318_v33 = vadd.f32 %v2188_v61, %v2187_v15  ;;  %vm320_vm9 = vweird.f32 %v2188_v61 }
 0x11b   :  { %v880_v8 = vmul.f32 %v864_v36, %v2189_v57  ;;  %v815_v29 = vsub.f32 0.0, %v783_v55  ;;  %v572_v34 = vadd.f32 -1.4531521, %v556_v32  ;;  %v342_v30 = vsel %vm1955_vm8, %v341_v4, %v337_v53  ;;  %vm1975_vm10 = vmor %vm319_vm4, %vm320_vm9  ;;  %v2201_v4 = vld [vmem:[#allocation21_spill] sm:$0xff] }
 0x11c   :  { %v782_v46 = vsub.f32 1.0, %v766_v22  ;;  %v653_v60 = vmul.f32 %v637_v1, %v1914_v0  ;;  %v555_v12 = vmul.f32 1.0614054, %v342_v30  ;;  %v322_v47 = vsel %vm1975_vm10, %v2188_v61, %v318_v33 }
 0x11d   :  { %927 = vmatpush.msra.mxu1 %v880_v8  ;;  %988 = vmatpush.msrb.mxu3 %v880_v8  ;;  %v831_v31 = vsel %vm799_vm6, %v783_v55, %v815_v29  ;;  %v588_v51 = vmul.f32 %v572_v34, %v1953_v54  ;;  %v323_v50 = vand.u32 2147483647, %v2175_v39  ;;  %v325_v25 = vand.u32 2147483648, %v2175_v39 }
 0x11e   :  { %v863_v28 = vadd.f32 1.0, %v831_v31  ;;  %v814_v17 = vsub.f32 0.0, %v782_v46  ;;  %v669_v11 = vadd.f32 0.2548296, %v653_v60  ;;  %v571_v48 = vadd.f32 -1.4531521, %v555_v12 }
 0x11f   :  { %vm798_vm11 = vcmp.ge.f32.partialorder %v2192_v42, 0.0  ;;  %v604_v62 = vadd.f32 1.4214138, %v588_v51  ;;  %vm324_vm12 = vcmp.eq.f32.partialorder %v323_v50, 8.507059e+37  ;;  %v326_v20 = vor.u32 1.1754944e-38, %v325_v25  ;;  %v2202_v31 = vld [vmem:[#allocation7_spill] sm:$0xff] }
 0x120   :  { %v879_v27 = vmul.f32 %v863_v28, %v2193_v7  ;;  %v830_v49 = vsel %vm798_vm11, %v782_v46, %v814_v17  ;;  %v685_v45 = vmul.f32 %v669_v11, %v1914_v0  ;;  %v587_v23 = vmul.f32 %v571_v48, %v342_v30  ;;  %v2203_v25 = vld [vmem:[#allocation6_spill] sm:$0xff]  ;;  %v2204_v42 = vld [vmem:[#allocation4_spill] sm:$0xff] }
 0x121   :  { %v846_v41 = vmul.f32 0.5, %v2194_v37  ;;  %v862_v13 = vadd.f32 1.0, %v830_v49  ;;  %v620_v39 = vmul.f32 %v604_v62, %v1953_v54  ;;  %v327_v6 = vsel %vm324_vm12, %v326_v20, %v322_v47 }
 0x122   :  { %928 = vmatpush.msra.mxu1 %v879_v27  ;;  %989 = vmatpush.msrb.mxu3 %v879_v27  ;;  %v765_v21 = vmul.f32 %v2195_v14, %v685_v45  ;;  %v603_v43 = vadd.f32 1.4214138, %v587_v23  ;;  %v554_v9 = vmul.f32 1.0614054, %v327_v6  ;;  %v732_v18 = vmul.f32 1.442695, %v2196_v10 }
 0x123   :  { %v878_v53 = vmul.f32 %v862_v13, %v846_v41  ;;  %v636_v35 = vadd.f32 -0.28449672, %v620_v39  ;;  %1057 = vpow2.f32 %v2197_v40  ;;  %v2199_v16 = vsub.f32 0.0, %v2198_v56  ;;  %v2205_v27 = vld [vmem:[#allocation3_spill] sm:$0xff]  ;;  %v2206_v13 = vld [vmem:[#allocation10_spill] sm:$0xff]  ;;  %v893_v10 = vld [vmem:[%s2037_s3 + $0x18] sm:$0xff] }
 0x124   :  { %v781_v0 = vsub.f32 1.0, %v765_v21  ;;  %v619_v3 = vmul.f32 %v603_v43, %v342_v30  ;;  %v570_v44 = vadd.f32 -1.4531521, %v554_v9  ;;  %1059 = vpow2.f32 %v732_v18  ;;  %v890_v9 = vld [vmem:[%s2037_s3] sm:$0xff]  ;;  %v891_v18 = vld [vmem:[%s2037_s3 + $0x8] sm:$0xff] }
 0x125   :  { %v714_v59 = vmul.f32 %v2199_v16, %v2198_v56  ;;  %929 = vmatpush.msra.mxu1 %v878_v53  ;;  %990 = vmatpush.msrb.mxu3 %v878_v53  ;;  %v652_v38 = vmul.f32 %v636_v35, %v1953_v54  ;;  %vm797_vm13 = vcmp.ge.f32.partialorder %v2200_v52, 0.0  ;;  %v845_v63 = vmul.f32 0.5, %v2201_v4  ;;  %v892_v53 = vld [vmem:[%s2037_s3 + $0x10] sm:$0xff]  ;;  %v901_v35 = vpop.permute.xlu1 %900  ;;  %v906_v16 = vpop.permute.xlu2 %905 }
 0x126   :  { %v813_v5 = vsub.f32 0.0, %v781_v0  ;;  %v635_v26 = vadd.f32 -0.28449672, %v619_v3  ;;  %v586_v58 = vmul.f32 %v570_v44, %v327_v6  ;;  %vm796_vm14 = vcmp.ge.f32.partialorder %v2202_v31, 0.0 }
 0x127   :  { %v668_v2 = vadd.f32 0.2548296, %v652_v38  ;;  %v730_v32 = vmul.f32 1.442695, %v714_v59  ;;  %v844_v28 = vmul.f32 0.5, %v2203_v25  ;;  %vm795_vm15 = vcmp.ge.f32.partialorder %v2204_v42, 0.0 }
 0x128   :  { %v829_v24 = vsel %vm797_vm13, %v781_v0, %v813_v5  ;;  %v651_v36 = vmul.f32 %v635_v26, %v342_v30  ;;  %v602_v55 = vadd.f32 1.4214138, %v586_v58  ;;  %v843_v49 = vmul.f32 0.5, %v2205_v27  ;;  %v911_v5 = vpop.permute.xlu0 %910 }
 0x129   :  { %v861_v22 = vadd.f32 1.0, %v829_v24  ;;  %v684_v1 = vmul.f32 %v668_v2, %v1953_v54  ;;  %v1058_v15 = vpop.eup %1057  ;;  %1061 = vpow2.f32 %v730_v32  ;;  %vm794_vm0 = vcmp.ge.f32.partialorder %v2206_v13, 0.0 }
 0x12a   :  { %v667_v61 = vadd.f32 0.2548296, %v651_v36  ;;  %v618_v33 = vmul.f32 %v602_v55, %v327_v6  ;;  %v1060_v19 = vpop.eup %1059 }
 0x12b   :  { %v877_v57 = vmul.f32 %v861_v22, %v845_v63  ;;  %v764_v8 = vmul.f32 %v1058_v15, %v684_v1 }
 0x12c   :  { %v683_v29 = vmul.f32 %v667_v61, %v342_v30  ;;  %v634_v34 = vadd.f32 -0.28449672, %v618_v33 }
 0x12d   :  { %930 = vmatpush.msra.mxu1 %v877_v57  ;;  %991 = vmatpush.msrb.mxu3 %v877_v57  ;;  %v780_v46 = vsub.f32 1.0, %v764_v8  ;;  %v916_v3 = vpop.permute.xlu1 %915 }
 0x12e   :  { %v763_v60 = vmul.f32 %v1060_v19, %v683_v29  ;;  %v650_v12 = vmul.f32 %v634_v34, %v327_v6 }
 0x12f   :  { %v812_v47 = vsub.f32 0.0, %v780_v46  ;;  %v1062_v30 = vpop.eup %1061 }
 0x130   :  { %v779_v51 = vsub.f32 1.0, %v763_v60  ;;  %v666_v50 = vadd.f32 0.2548296, %v650_v12 }
 0x131   :  { %v828_v54 = vsel %vm796_vm14, %v780_v46, %v812_v47 }
 0x132   :  { %v860_v17 = vadd.f32 1.0, %v828_v54  ;;  %v811_v11 = vsub.f32 0.0, %v779_v51  ;;  %v682_v48 = vmul.f32 %v666_v50, %v327_v6  ;;  %v2207_v6 = vld [vmem:[#allocation9_spill] sm:$0xff] }
 0x133   :  { %v842_v14 = vmul.f32 0.5, %v2207_v6 }
 0x134   :  { %v876_v62 = vmul.f32 %v860_v17, %v844_v28  ;;  %v827_v20 = vsel %vm795_vm15, %v779_v51, %v811_v11  ;;  %v762_v7 = vmul.f32 %v1062_v30, %v682_v48 }
 0x135   :  { %v859_v45 = vadd.f32 1.0, %v827_v20 }
 0x136   :  { %931 = vmatpush.msra.mxu1 %v876_v62  ;;  %992 = vmatpush.msrb.mxu3 %v876_v62  ;;  %v778_v23 = vsub.f32 1.0, %v762_v7 }
 0x137   :  { %v875_v37 = vmul.f32 %v859_v45, %v843_v49 }
 0x138   :  { %v810_v41 = vsub.f32 0.0, %v778_v23 }
 0x139   :  { %932 = vmatpush.msra.mxu1 %v875_v37  ;;  %993 = vmatpush.msrb.mxu3 %v875_v37 }
 0x13a   :  { %v826_v39 = vsel %vm794_vm0, %v778_v23, %v810_v41 }
 0x13b   :  { %v858_v21 = vadd.f32 1.0, %v826_v39 }
 0x13d   :  { %v874_v43 = vmul.f32 %v858_v21, %v842_v14 }
 0x13f   :  { %933 = vmatpush.msra.mxu1 %v874_v43  ;;  %994 = vmatpush.msrb.mxu3 %v874_v43 }
 0x140   :  { %934 = vmatmul.f32.vlgmr.msra.gmra.mxu1 %v890_v9  ;;  %943 = vmatmul.f32.vlgmr.msrb.gmra.mxu3 %v893_v10 }
 0x148   :  { %937 = vmatmul.f32.gmra.mxu1 %v891_v18 }
 0x150   :  { %940 = vmatmul.f32.gmra.mxu1 %v892_v53 }
 0x1bd   :  { %v935_v40 = vpop.f32.mrf.mxu1 }
 0x1be   :  { %v936_v0 = vadd.f32 %v935_v40, %v901_v35 }
 0x1c0   :  { %947 = vst [vmem:[%s2038_s5] sm:$0xff] %v936_v0 }
 0x1c3   :  { %v944_v44 = vpop.f32.mrf.mxu3 }
 0x1c4   :  { %v945_v56 = vadd.f32 %v944_v44, %v916_v3 }
 0x1c5   :  { %v938_v59 = vpop.f32.mrf.mxu1 }
 0x1c6   :  { %950 = vst [vmem:[%s2038_s5 + $0x18] sm:$0xff] %v945_v56  ;;  %v939_v38 = vadd.f32 %v938_v59, %v906_v16 }
 0x1c8   :  { %948 = vst [vmem:[%s2038_s5 + $0x8] sm:$0xff] %v939_v38 }
 0x1cd   :  { %v941_v26 = vpop.f32.mrf.mxu1 }
 0x1ce   :  { %v942_v58 = vadd.f32 %v941_v26, %v911_v5 }
 0x1d0   :  { %949 = vst [vmem:[%s2038_s5 + $0x10] sm:$0xff] %v942_v58 }

// kernel: _tnt_mlp.1
= control target key start
LH: loop header
LB: loop body
LE: loop exit
PB: predicated region body
PF: predicated region fallthrough
CT: control target
= control target key end

     0   :  { %v1063_v0 = vmov 0   ;;  %vm136_vm0 = vcmask 261120   ;;  %s2033_s2 = inlined_call_operand.vmem [shape: f32[128,1], index: 2, kind: input, shape index: {}]   ;;  %s2034_s0 = inlined_call_operand.vmem [shape: f32[32,128], index: 0, kind: input, shape index: {}]   ;;  %s2035_s1 = inlined_call_operand.vmem [shape: f32[128,32], index: 1, kind: input, shape index: {}]   ;;  %s2036_s4 = inlined_call_operand.vmem [shape: f32[32,1], index: 4, kind: input, shape index: {}]   ;;  %s2037_s3 = inlined_call_operand.vmem [shape: f32[32,128], index: 3, kind: input, shape index: {}]   ;;  %s2038_s5 = inlined_call_operand.vmem [shape: f32[32,128], index: 5, kind: output, shape index: {}]  }
   0x1   :  { %996 = vset.pattern.permute.xlu0 %v1063_v0  ;;  %v55_v1 = vld [vmem:[%s2033_s2 + $0x78] sm:$0xff]  ;;  %997 = vset.pattern.permute.xlu1 %v1063_v0  ;;  %v53_v3 = vld [vmem:[%s2033_s2 + $0x68] sm:$0xff]  ;;  %v38_v4 = vld [vmem:[%s2034_s0 + $0x10] sm:$0xff] }
   0x2   :  { %v39_v2 = vld [vmem:[%s2034_s0 + $0x18] sm:$0xff]  ;;  %133 = vperm.xlu0 %996, %v55_v1   ;;  %v37_v5 = vld [vmem:[%s2034_s0 + $0x8] sm:$0xff]  ;;  %123 = vperm.xlu1 %997, %v53_v3   ;;  %v36_v6 = vld [vmem:[%s2034_s0] sm:$0xff] }
   0x3   :  { %197 = vmatpush.msra.mxu0 %v39_v2  ;;  %971 = vmatpush.msra.mxu2 %v39_v2  ;;  %v51_v7 = vld [vmem:[%s2033_s2 + $0x58] sm:$0xff]  ;;  %v20_v8 = vld [vmem:[%s2035_s1] sm:$0xff]  ;;  %v26_v9 = vld [vmem:[%s2035_s1 + $0x30] sm:$0xff] }
   0x4   :  { %972 = vmatpush.msra.mxu3 %v39_v2  ;;  %998 = vset.pattern.permute.xlu2 %v1063_v0  ;;  %v32_v10 = vld [vmem:[%s2035_s1 + $0x60] sm:$0xff]  ;;  %v54_v11 = vld [vmem:[%s2033_s2 + $0x70] sm:$0xff]  ;;  %v21_v14 = vld [vmem:[%s2035_s1 + $0x8] sm:$0xff] }
   0x5   :  { %198 = vmatpush.msra.mxu0 %v38_v4  ;;  %973 = vmatpush.msra.mxu2 %v38_v4  ;;  %v52_v12 = vld [vmem:[%s2033_s2 + $0x60] sm:$0xff]  ;;  %v50_v13 = vld [vmem:[%s2033_s2 + $0x50] sm:$0xff]  ;;  %v27_v15 = vld [vmem:[%s2035_s1 + $0x38] sm:$0xff] }
   0x6   :  { %974 = vmatpush.msra.mxu3 %v38_v4  ;;  %113 = vperm.xlu2 %998, %v51_v7   ;;  %v33_v16 = vld [vmem:[%s2035_s1 + $0x68] sm:$0xff]  ;;  %v48_v18 = vld [vmem:[%s2033_s2 + $0x40] sm:$0xff]  ;;  %v47_v19 = vld [vmem:[%s2033_s2 + $0x38] sm:$0xff] }
   0x7   :  { %199 = vmatpush.msra.mxu0 %v37_v5  ;;  %975 = vmatpush.msra.mxu2 %v37_v5  ;;  %v49_v17 = vld [vmem:[%s2033_s2 + $0x48] sm:$0xff]  ;;  %v22_v20 = vld [vmem:[%s2035_s1 + $0x10] sm:$0xff]  ;;  %v28_v21 = vld [vmem:[%s2035_s1 + $0x40] sm:$0xff] }
   0x8   :  { %976 = vmatpush.msra.mxu3 %v37_v5  ;;  %v34_v22 = vld [vmem:[%s2035_s1 + $0x70] sm:$0xff]  ;;  %v45_v24 = vld [vmem:[%s2033_s2 + $0x28] sm:$0xff]  ;;  %v44_v25 = vld [vmem:[%s2033_s2 + $0x20] sm:$0xff] }
   0x9   :  { %200 = vmatpush.msra.mxu0 %v36_v6  ;;  %977 = vmatpush.msra.mxu2 %v36_v6  ;;  %v46_v23 = vld [vmem:[%s2033_s2 + $0x30] sm:$0xff]  ;;  %v23_v26 = vld [vmem:[%s2035_s1 + $0x18] sm:$0xff]  ;;  %v29_v27 = vld [vmem:[%s2035_s1 + $0x48] sm:$0xff] }
   0xa   :  { %978 = vmatpush.msra.mxu3 %v36_v6  ;;  %955 = vmatmul.msk.f32.vlgmr.msra.gmra.mxu0 %vm136_vm0, %v20_v8  ;;  %v35_v28 = vld [vmem:[%s2035_s1 + $0x78] sm:$0xff]  ;;  %v42_v30 = vld [vmem:[%s2033_s2 + $0x10] sm:$0xff]  ;;  %v41_v31 = vld [vmem:[%s2033_s2 + $0x8] sm:$0xff] }
   0xb   :  { %961 = vmatmul.msk.f32.vlgmr.msra.gmra.mxu2 %vm136_vm0, %v26_v9  ;;  %967 = vmatmul.msk.f32.vlgmr.msra.gmra.mxu3 %vm136_vm0, %v32_v10  ;;  %v43_v29 = vld [vmem:[%s2033_s2 + $0x18] sm:$0xff]  ;;  %v24_v32 = vld [vmem:[%s2035_s1 + $0x20] sm:$0xff]  ;;  %v30_v33 = vld [vmem:[%s2035_s1 + $0x50] sm:$0xff] }
   0xc   :  { %128 = vperm.xlu0 %996, %v54_v11   ;;  %118 = vperm.xlu1 %997, %v52_v12   ;;  %v40_v34 = vld [vmem:[%s2033_s2] sm:$0xff]  ;;  %v895_v36 = vld [vmem:[%s2036_s4 + $0x8] sm:$0xff]  ;;  %v31_v38 = vld [vmem:[%s2035_s1 + $0x58] sm:$0xff] }
   0xd   :  { %v894_v35 = vld [vmem:[%s2036_s4] sm:$0xff]  ;;  %v25_v37 = vld [vmem:[%s2035_s1 + $0x28] sm:$0xff]  ;;  %v896_v39 = vld [vmem:[%s2036_s4 + $0x10] sm:$0xff] }
   0xe   :  { %108 = vperm.xlu2 %998, %v50_v13   ;;  %v897_v40 = vld [vmem:[%s2036_s4 + $0x18] sm:$0xff] }
  0x12   :  { %956 = vmatmul.msk.f32.gmra.mxu0 %vm136_vm0, %v21_v14 }
  0x13   :  { %962 = vmatmul.msk.f32.gmra.mxu2 %vm136_vm0, %v27_v15  ;;  %968 = vmatmul.msk.f32.gmra.mxu3 %vm136_vm0, %v33_v16 }
  0x14   :  { %103 = vperm.xlu0 %996, %v49_v17   ;;  %98 = vperm.xlu1 %997, %v48_v18  }
  0x16   :  { %93 = vperm.xlu2 %998, %v47_v19  }
  0x1a   :  { %957 = vmatmul.msk.f32.gmra.mxu0 %vm136_vm0, %v22_v20 }
  0x1b   :  { %963 = vmatmul.msk.f32.gmra.mxu2 %vm136_vm0, %v28_v21  ;;  %969 = vmatmul.msk.f32.gmra.mxu3 %vm136_vm0, %v34_v22 }
  0x1c   :  { %88 = vperm.xlu0 %996, %v46_v23   ;;  %83 = vperm.xlu1 %997, %v45_v24  }
  0x1e   :  { %78 = vperm.xlu2 %998, %v44_v25  }
  0x22   :  { %958 = vmatmul.msk.f32.gmra.mxu0 %vm136_vm0, %v23_v26 }
  0x23   :  { %964 = vmatmul.msk.f32.gmra.mxu2 %vm136_vm0, %v29_v27  ;;  %970 = vmatmul.msk.f32.gmra.mxu3 %vm136_vm0, %v35_v28 }
  0x24   :  { %73 = vperm.xlu0 %996, %v43_v29   ;;  %68 = vperm.xlu1 %997, %v42_v30  }
  0x26   :  { %63 = vperm.xlu2 %998, %v41_v31  }
  0x2a   :  { %959 = vmatmul.msk.f32.gmra.mxu0 %vm136_vm0, %v24_v32 }
  0x2b   :  { %965 = vmatmul.msk.f32.gmra.mxu2 %vm136_vm0, %v30_v33 }
  0x2c   :  { %58 = vperm.xlu0 %996, %v40_v34   ;;  %900 = vperm.xlu1 %997, %v894_v35  }
  0x2e   :  { %905 = vperm.xlu2 %998, %v895_v36  }
  0x32   :  { %960 = vmatmul.msk.f32.gmra.mxu0 %vm136_vm0, %v25_v37 }
  0x33   :  { %966 = vmatmul.msk.f32.gmra.mxu2 %vm136_vm0, %v31_v38 }
  0x34   :  { %910 = vperm.xlu0 %996, %v896_v39   ;;  %915 = vperm.xlu1 %997, %v897_v40  }
  0x60   :  { %v1230_v41 = vpop.permute.xlu2 %113 }
  0x68   :  { %v1232_v42 = vpop.permute.xlu2 %108 }
  0x70   :  { %v94_v45 = vpop.permute.xlu2 %93 }
  0x74   :  { %v1234_v43 = vpop.permute.xlu0 %133  ;;  %v124_v44 = vpop.permute.xlu1 %123 }
  0x78   :  { %v1238_v48 = vpop.permute.xlu2 %78 }
  0x7e   :  { %v1236_v46 = vpop.permute.xlu0 %128  ;;  %v119_v47 = vpop.permute.xlu1 %118 }
  0x80   :  { %v64_v52 = vpop.permute.xlu2 %63 }
  0x86   :  { %v1240_v49 = vpop.permute.xlu0 %103  ;;  %v99_v50 = vpop.permute.xlu1 %98 }
  0x87   :  { %v202_v51 = vpop.f32.mrf.mxu0 }
  0x8e   :  { %v89_v53 = vpop.permute.xlu0 %88  ;;  %v220_v54 = vpop.f32.mrf.mxu2 }
  0x8f   :  { %v1242_v55 = vadd.f32 %v220_v54, %v89_v53  ;;  %v238_v56 = vpop.f32.mrf.mxu3  ;;  %v1246_v58 = vpop.permute.xlu1 %83 }
  0x90   :  { %v1244_v57 = vadd.f32 %v238_v56, %v119_v47  ;;  %v205_v59 = vpop.f32.mrf.mxu0 }
  0x91   :  { %v1249_v60 = vmul.f32 0.70710677, %v1242_v55  ;;  %v1251_v61 = vadd.f32 %v205_v59, %v64_v52 }
  0x92   :  { %v1254_v62 = vmul.f32 0.70710677, %v1244_v57 }
  0x93   :  { %2075 = vst [vmem:[#allocation2_spill] sm:$0xff] %v1249_v60  ;;  %v1257_v63 = vmul.f32 0.70710677, %v1251_v61  ;;  %v272_v0 = vand.u32 2147483647, %v1249_v60 }
  0x94   :  { %2076 = vst [vmem:[#allocation3_spill] sm:$0xff] %v1251_v61  ;;  %v278_v3 = vand.u32 2147483647, %v1254_v62 }
  0x95   :  { %2077 = vst [vmem:[#allocation4_spill] sm:$0xff] %v1257_v63  ;;  %v1264_v5 = vand.u32 2147483647, %v1257_v63  ;;  %v288_v8 = vmul.f32 0.3275911, %v272_v0  ;;  %v704_v13 = vsub.f32 0.0, %v272_v0 }
  0x96   :  { %v1260_v1 = vpop.permute.xlu0 %73  ;;  %v223_v2 = vpop.f32.mrf.mxu2  ;;  %v294_v11 = vmul.f32 0.3275911, %v278_v3  ;;  %v710_v25 = vsub.f32 0.0, %v278_v3 }
  0x97   :  { %v241_v4 = vpop.f32.mrf.mxu3  ;;  %v1266_v6 = vadd.f32 %v223_v2, %v94_v45  ;;  %v69_v9 = vpop.permute.xlu1 %68  ;;  %v283_v14 = vmul.f32 0.3275911, %v1264_v5  ;;  %v1277_v16 = vadd.f32 1.0, %v288_v8  ;;  %v720_v24 = vmul.f32 %v704_v13, %v272_v0 }
  0x98   :  { %v1268_v7 = vadd.f32 %v241_v4, %v124_v44  ;;  %v208_v10 = vpop.f32.mrf.mxu0  ;;  %v1283_v20 = vadd.f32 1.0, %v294_v11  ;;  %v726_v33 = vmul.f32 %v710_v25, %v278_v3  ;;  %v699_v59 = vsub.f32 0.0, %v1264_v5 }
  0x99   :  { %v1271_v12 = vmul.f32 0.70710677, %v1266_v6  ;;  %v1280_v18 = vadd.f32 %v208_v10, %v69_v9  ;;  %v1288_v26 = vadd.f32 1.0, %v283_v14  ;;  %999 = vrcp.f32 %v1277_v16 }
  0x9a   :  { %v1275_v15 = vmul.f32 0.70710677, %v1268_v7  ;;  %1001 = vrcp.f32 %v1283_v20  ;;  %v742_v32 = vmul.f32 1.442695, %v720_v24  ;;  %v754_v52 = vmul.f32 1.442695, %v726_v33 }
  0x9b   :  { %2078 = vst [vmem:[#allocation5_spill] sm:$0xff] %v1271_v12  ;;  %v273_v17 = vand.u32 2147483647, %v1271_v12  ;;  %v1286_v22 = vmul.f32 0.70710677, %v1280_v18  ;;  %1003 = vrcp.f32 %v1288_v26  ;;  %v1332_v8 = vmul.f32 0.5, %v1242_v55 }
  0x9c   :  { %2079 = vst [vmem:[#allocation6_spill] sm:$0xff] %v1280_v18  ;;  %v279_v19 = vand.u32 2147483647, %v1275_v15  ;;  %v1344_v14 = vmul.f32 0.5, %v1244_v57  ;;  %vm499_vm5 = vweird.f32 %v1283_v20 }
  0x9d   :  { %v289_v21 = vmul.f32 0.3275911, %v273_v17  ;;  %2080 = vst [vmem:[#allocation7_spill] sm:$0xff] %v1286_v22  ;;  %v1292_v28 = vand.u32 2147483647, %v1286_v22  ;;  %v705_v30 = vsub.f32 0.0, %v273_v17 }
  0x9e   :  { %v59_v23 = vpop.permute.xlu0 %58  ;;  %2081 = vst [vmem:[#allocation8_spill] sm:$0xff] %v1288_v26  ;;  %v295_v27 = vmul.f32 0.3275911, %v279_v19  ;;  %v226_v34 = vpop.f32.mrf.mxu2  ;;  %v711_v39 = vsub.f32 0.0, %v279_v19 }
  0x9f   :  { %v1294_v29 = vadd.f32 1.0, %v289_v21  ;;  %v1296_v31 = vadd.f32 %v202_v51, %v59_v23  ;;  %v244_v35 = vpop.f32.mrf.mxu3  ;;  %v284_v37 = vmul.f32 0.3275911, %v1292_v28  ;;  %v721_v38 = vmul.f32 %v705_v30, %v273_v17  ;;  %v1307_v44 = vpop.eup %999  ;;  %2088 = vst [vmem:[#allocation15_spill] sm:$0xff] %v1332_v8 }
  0xa0   :  { %v1300_v36 = vadd.f32 1.0, %v295_v27  ;;  %v1311_v47 = vadd.f32 %v226_v34, %v99_v50  ;;  %v1314_v51 = vadd.f32 %v244_v35, %v1236_v46  ;;  %v211_v54 = vpop.f32.mrf.mxu0  ;;  %v1319_v56 = vpop.eup %1001  ;;  %v405_v46 = vmul.f32 %v1307_v44, %v1277_v16 }
  0xa1   :  { %2082 = vst [vmem:[#allocation9_spill] sm:$0xff] %v1296_v31  ;;  %1005 = vrcp.f32 %v1294_v29  ;;  %v1305_v40 = vmul.f32 0.70710677, %v1296_v31  ;;  %v1309_v45 = vadd.f32 1.0, %v284_v37  ;;  %v1326_v50 = vpop.eup %1003  ;;  %v744_v2 = vmul.f32 1.442695, %v721_v38 }
  0xa2   :  { %1007 = vpow2.f32 %v742_v32  ;;  %v1324_v0 = vmul.f32 0.70710677, %v1311_v47  ;;  %2087 = vst [vmem:[#allocation14_spill] sm:$0xff] %v1326_v50  ;;  %v727_v3 = vmul.f32 %v711_v39, %v279_v19  ;;  %v1337_v10 = vmul.f32 0.70710677, %v1314_v51 }
  0xa3   :  { %2083 = vst [vmem:[#allocation10_spill] sm:$0xff] %v1305_v40  ;;  %v1317_v53 = vand.u32 2147483647, %v1305_v40  ;;  %1009 = vrcp.f32 %v1300_v36  ;;  %v495_v13 = vmul.f32 %v1319_v56, %v1283_v20  ;;  %v330_v55 = vmul.f32 %v1326_v50, %v1288_v26 }
  0xa4   :  { %2084 = vst [vmem:[#allocation11_spill] sm:$0xff] %v1309_v45  ;;  %1011 = vrcp.f32 %v1309_v45  ;;  %v274_v9 = vand.u32 2147483647, %v1324_v0  ;;  %v700_v19 = vsub.f32 0.0, %v1292_v28  ;;  %v280_v23 = vand.u32 2147483647, %v1337_v10 }
  0xa5   :  { %2085 = vst [vmem:[#allocation12_spill] sm:$0xff] %v1317_v53  ;;  %v282_v4 = vmul.f32 0.3275911, %v1317_v53  ;;  %1013 = vpow2.f32 %v754_v52  ;;  %v406_v25 = vsub.f32 1.0, %v405_v46  ;;  %v1355_v27 = vmul.f32 %v699_v59, %v1264_v5 }
  0xa6   :  { %2086 = vst [vmem:[#allocation13_spill] sm:$0xff] %v1324_v0  ;;  %v290_v21 = vmul.f32 0.3275911, %v274_v9  ;;  %1015 = vpow2.f32 %v744_v2  ;;  %v756_v30 = vmul.f32 1.442695, %v727_v3  ;;  %v706_v34 = vsub.f32 0.0, %v274_v9  ;;  %v229_v5 = vpop.f32.mrf.mxu2 }
  0xa7   :  { %v1339_v11 = vpop.eup %1005  ;;  %v1346_v17 = vadd.f32 1.0, %v282_v4  ;;  %2091 = vst [vmem:[#allocation18_spill] sm:$0xff] %v1355_v27  ;;  %v296_v35 = vmul.f32 0.3275911, %v280_v23  ;;  %v496_v37 = vsub.f32 1.0, %v495_v13  ;;  %v1364_v38 = vmul.f32 0.5, %v1266_v6  ;;  %v247_v52 = vpop.f32.mrf.mxu3 }
  0xa8   :  { %v1352_v24 = vpop.eup %1007  ;;  %v420_v32 = vmul.f32 %v1339_v11, %v1294_v29  ;;  %v1361_v33 = vadd.f32 1.0, %v290_v21  ;;  %v1367_v39 = vmul.f32 0.5, %v1268_v7  ;;  %v331_v46 = vsub.f32 1.0, %v330_v55  ;;  %v214_v21 = vpop.f32.mrf.mxu0 }
  0xa9   :  { %2089 = vst [vmem:[#allocation16_spill] sm:$0xff] %v1346_v17  ;;  %v1357_v57 = vpop.eup %1009  ;;  %1017 = vrcp.f32 %v1346_v17  ;;  %v716_v2 = vmul.f32 %v700_v19, %v1292_v28  ;;  %v1374_v3 = vadd.f32 1.0, %v296_v35  ;;  %v1379_v6 = vmul.f32 %v1307_v44, %v406_v25 }
  0xaa   :  { %2090 = vst [vmem:[#allocation17_spill] sm:$0xff] %v1352_v24  ;;  %v1370_v59 = vpop.eup %1011  ;;  %1019 = vrcp.f32 %v1361_v33  ;;  %v510_v7 = vmul.f32 %v1357_v57, %v1300_v36  ;;  %v1384_v13 = vadd.f32 %v211_v54, %v1260_v1  ;;  %v421_v55 = vsub.f32 1.0, %v420_v32 }
  0xab   :  { %2092 = vst [vmem:[#allocation19_spill] sm:$0xff] %v1364_v38  ;;  %v1376_v4 = vpop.eup %1013  ;;  %1021 = vpow2.f32 %v756_v30  ;;  %v722_v31 = vmul.f32 %v706_v34, %v274_v9  ;;  %v230_v28 = vadd.f32 %v229_v5, %v1240_v49  ;;  %v248_v19 = vadd.f32 %v247_v52, %v1234_v43 }
  0xac   :  { %2093 = vst [vmem:[#allocation20_spill] sm:$0xff] %v1370_v59  ;;  %v1388_v35 = vpop.eup %1015  ;;  %v1391_v40 = vmul.f32 %v1319_v56, %v496_v37  ;;  %v345_v25 = vmul.f32 %v1370_v59, %v1309_v45  ;;  %1023 = vrcp.f32 %v1374_v3  ;;  %v1397_v1 = vmul.f32 0.70710677, %v1384_v13 }
  0xad   :  { %2094 = vst [vmem:[#allocation21_spill] sm:$0xff] %v1384_v13  ;;  %v1400_v54 = vmul.f32 %v1326_v50, %v331_v46  ;;  %v1402_v9 = vmul.f32 1.442695, %v716_v2  ;;  %v712_v49 = vsub.f32 0.0, %v280_v23  ;;  %v1404_v43 = vmul.f32 0.70710677, %v230_v28 }
  0xae   :  { %2095 = vst [vmem:[#allocation22_spill] sm:$0xff] %v1388_v35  ;;  %v1410_v34 = vmul.f32 0.5, %v1311_v47  ;;  %v269_v37 = vand.u32 2147483647, %v1397_v1  ;;  %v1413_v5 = vmul.f32 0.70710677, %v248_v19  ;;  %v1418_v46 = vmul.f32 %v1339_v11, %v421_v55 }
  0xaf   :  { %2096 = vst [vmem:[#allocation23_spill] sm:$0xff] %v1397_v1  ;;  %v1406_v30 = vpop.eup %1017  ;;  %v511_v2 = vsub.f32 1.0, %v510_v7  ;;  %v746_v61 = vmul.f32 1.442695, %v722_v31  ;;  %v275_v63 = vand.u32 2147483647, %v1404_v43  ;;  %v728_v53 = vmul.f32 %v712_v49, %v280_v23 }
  0xb0   :  { %2097 = vst [vmem:[#allocation24_spill] sm:$0xff] %v1400_v54  ;;  %v1415_v52 = vpop.eup %1019  ;;  %v346_v22 = vsub.f32 1.0, %v345_v25  ;;  %v285_v32 = vmul.f32 0.3275911, %v269_v37  ;;  %v701_v13 = vsub.f32 0.0, %v269_v37  ;;  %v315_v1 = vmul.f32 %v1406_v30, %v1346_v17 }
  0xb1   :  { %2098 = vst [vmem:[#allocation25_spill] sm:$0xff] %v1402_v9  ;;  %v1421_v18 = vpop.eup %1021  ;;  %v281_v47 = vand.u32 2147483647, %v1413_v5  ;;  %v291_v9 = vmul.f32 0.3275911, %v275_v63  ;;  %v707_v27 = vsub.f32 0.0, %v275_v63  ;;  %v435_v31 = vmul.f32 %v1415_v52, %v1361_v33 }
  0xb2   :  { %2099 = vst [vmem:[#allocation26_spill] sm:$0xff] %v1406_v30  ;;  %v1426_v8 = vpop.eup %1023  ;;  %v1430_v7 = vadd.f32 1.0, %v285_v32  ;;  %v717_v55 = vmul.f32 %v701_v13, %v269_v37  ;;  %1025 = vpow2.f32 %v746_v61  ;;  %v1437_v23 = vmul.f32 %v1357_v57, %v511_v2  ;;  %v232_v13 = vpop.f32.mrf.mxu2 }
  0xb3   :  { %2100 = vst [vmem:[#allocation27_spill] sm:$0xff] %v1410_v34  ;;  %v297_v38 = vmul.f32 0.3275911, %v281_v47  ;;  %v525_v25 = vmul.f32 %v1426_v8, %v1374_v3  ;;  %v1434_v50 = vadd.f32 1.0, %v291_v9  ;;  %v713_v54 = vsub.f32 0.0, %v281_v47  ;;  %v217_v32 = vpop.f32.mrf.mxu0 }
  0xb4   :  { %2101 = vst [vmem:[#allocation28_spill] sm:$0xff] %v1430_v7  ;;  %v1440_v49 = vmul.f32 %v1370_v59, %v346_v22  ;;  %v1443_v24 = vmul.f32 0.5, %v1314_v51  ;;  %1027 = vrcp.f32 %v1430_v7  ;;  %v316_v61 = vsub.f32 1.0, %v315_v1 }
  0xb5   :  { %v758_v37 = vmul.f32 1.442695, %v728_v53  ;;  %1029 = vrcp.f32 %v1434_v50  ;;  %v723_v9 = vmul.f32 %v707_v27, %v275_v63  ;;  %v436_v17 = vsub.f32 1.0, %v435_v31 }
  0xb6   :  { %2102 = vst [vmem:[#allocation29_spill] sm:$0xff] %v1440_v49  ;;  %v736_v34 = vmul.f32 1.442695, %v717_v55  ;;  %v1447_v35 = vadd.f32 1.0, %v297_v38  ;;  %v1450_v2 = vadd.f32 %v214_v21, %v1238_v48  ;;  %v526_v22 = vsub.f32 1.0, %v525_v25 }
  0xb7   :  { %v729_v60 = vmul.f32 %v713_v54, %v281_v47  ;;  %v233_v51 = vadd.f32 %v232_v13, %v1232_v42  ;;  %v218_v59 = vadd.f32 %v217_v32, %v1246_v58  ;;  %v1454_v49 = vmul.f32 0.5, %v230_v28 }
  0xb8   :  { %2103 = vst [vmem:[#allocation30_spill] sm:$0xff] %v1450_v2  ;;  %1031 = vrcp.f32 %v1447_v35  ;;  %v1457_v53 = vmul.f32 0.5, %v248_v19  ;;  %v1460_v63 = vmul.f32 0.70710677, %v1450_v2  ;;  %v1462_v27 = vpop.eup %1025  ;;  %v748_v48 = vmul.f32 1.442695, %v723_v9 }
  0xb9   :  { %2104 = vst [vmem:[#allocation31_spill] sm:$0xff] %v1454_v49  ;;  %1033 = vpow2.f32 %v758_v37  ;;  %v1464_v38 = vmul.f32 0.70710677, %v233_v51  ;;  %v1466_v21 = vmul.f32 0.70710677, %v218_v59  ;;  %v1471_v58 = vmul.f32 %v1406_v30, %v316_v61 }
  0xba   :  { %2105 = vst [vmem:[#allocation32_spill] sm:$0xff] %v1460_v63  ;;  %v1468_v42 = vpop.eup %1027  ;;  %v1474_v28 = vmul.f32 %v1415_v52, %v436_v17  ;;  %1035 = vpow2.f32 %v736_v34  ;;  %v270_v19 = vand.u32 2147483647, %v1460_v63  ;;  %v527_v54 = vmul.f32 %v1426_v8, %v526_v22  ;;  %v235_v12 = vpop.f32.mrf.mxu2 }
  0xbb   :  { %2106 = vst [vmem:[#allocation33_spill] sm:$0xff] %v1462_v27  ;;  %v1477_v1 = vpop.eup %1029  ;;  %v760_v47 = vmul.f32 1.442695, %v729_v60  ;;  %v276_v31 = vand.u32 2147483647, %v1464_v38  ;;  %v360_v25 = vmul.f32 %v1468_v42, %v1430_v7  ;;  %vm529_vm1 = vweird.f32 %v1374_v3 }
  0xbc   :  { %2107 = vst [vmem:[#allocation34_spill] sm:$0xff] %v1466_v21  ;;  %v271_v55 = vand.u32 2147483647, %v1466_v21  ;;  %v450_v13 = vmul.f32 %v1477_v1, %v1434_v50  ;;  %v286_v17 = vmul.f32 0.3275911, %v270_v19  ;;  %v702_v32 = vsub.f32 0.0, %v270_v19 }
  0xbd   :  { %2108 = vst [vmem:[#allocation35_spill] sm:$0xff] %v1468_v42  ;;  %1037 = vpow2.f32 %v748_v48  ;;  %vm544_vm2 = vweird.f32 %v1447_v35  ;;  %v292_v34 = vmul.f32 0.3275911, %v276_v31  ;;  %v708_v61 = vsub.f32 0.0, %v276_v31 }
  0xbe   :  { %2109 = vst [vmem:[#allocation36_spill] sm:$0xff] %v1471_v58  ;;  %v1032_v60 = vpop.eup %1031  ;;  %v1488_v37 = vadd.f32 1.0, %v286_v17  ;;  %v718_v9 = vmul.f32 %v702_v32, %v270_v19  ;;  %v287_v22 = vmul.f32 0.3275911, %v271_v55  ;;  %v703_v2 = vsub.f32 0.0, %v271_v55 }
  0xbf   :  { %v1490_v63 = vpop.eup %1033  ;;  %v540_v30 = vmul.f32 %v1032_v60, %v1447_v35  ;;  %1039 = vpow2.f32 %v760_v47  ;;  %v1493_v58 = vadd.f32 1.0, %v292_v34  ;;  %v724_v21 = vmul.f32 %v708_v61, %v276_v31 }
  0xc0   :  { %v1495_v48 = vpop.eup %1035  ;;  %v361_v49 = vsub.f32 1.0, %v360_v25  ;;  %v451_v26 = vsub.f32 1.0, %v450_v13  ;;  %1041 = vrcp.f32 %v1488_v37  ;;  %v738_v17 = vmul.f32 1.442695, %v718_v9 }
  0xc1   :  { %2110 = vst [vmem:[#allocation37_spill] sm:$0xff] %v1495_v48  ;;  %v541_v27 = vsub.f32 1.0, %v540_v30  ;;  %1043 = vrcp.f32 %v1493_v58  ;;  %v750_v19 = vmul.f32 1.442695, %v724_v21  ;;  %v1499_v32 = vmul.f32 0.5, %v233_v51 }
  0xc2   :  { %v1501_v0 = vadd.f32 1.0, %v287_v22  ;;  %v719_v47 = vmul.f32 %v703_v2, %v271_v55  ;;  %v1503_v34 = vmul.f32 0.5, %v218_v59  ;;  %v236_v31 = vadd.f32 %v235_v12, %v1230_v41 }
  0xc3   :  { %v1506_v61 = vpop.eup %1037  ;;  %v542_v25 = vmul.f32 %v1032_v60, %v541_v27  ;;  %1045 = vpow2.f32 %v738_v17  ;;  %vm545_vm3 = vweird.f32 %v1032_v60  ;;  %v548_v13 = vand.u32 2147483647, %v1447_v35 }
  0xc4   :  { %2111 = vst [vmem:[#allocation38_spill] sm:$0xff] %v1503_v34  ;;  %vm514_vm4 = vweird.f32 %v1300_v36  ;;  %v1511_v30 = vmul.f32 %v1468_v42, %v361_v49  ;;  %v1514_v51 = vmul.f32 %v1477_v1, %v451_v26  ;;  %1047 = vrcp.f32 %v1501_v0  ;;  %vm1531_vm6 = vmor %vm544_vm2, %vm545_vm3 }
  0xc5   :  { %2112 = vst [vmem:[#allocation39_spill] sm:$0xff] %v1506_v61  ;;  %v1517_v59 = vmul.f32 0.70710677, %v236_v31  ;;  %v1519_v41 = vpop.eup %1039  ;;  %1049 = vpow2.f32 %v750_v19  ;;  %v740_v12 = vmul.f32 1.442695, %v719_v47  ;;  %v543_v2 = vadd.f32 %v1032_v60, %v542_v25 }
  0xc6   :  { %2113 = vst [vmem:[#allocation40_spill] sm:$0xff] %v1511_v30  ;;  %v550_v27 = vand.u32 2147483648, %v1447_v35  ;;  %v1522_v21 = vpop.eup %1041  ;;  %v1526_v55 = vmul.f32 0.5, %v236_v31  ;;  %vm549_vm7 = vcmp.eq.f32.partialorder %v548_v13, 8.507059e+37  ;;  %v528_v9 = vadd.f32 %v1426_v8, %v527_v54 }
  0xc7   :  { %v277_v49 = vand.u32 2147483647, %v1517_v59  ;;  %v1536_v22 = vpop.eup %1043  ;;  %v375_v17 = vmul.f32 %v1522_v21, %v1488_v37  ;;  %v547_v19 = vsel %vm1531_vm6, %v1032_v60, %v543_v2  ;;  %vm530_vm8 = vweird.f32 %v1426_v8 }
  0xc8   :  { %v551_v47 = vor.u32 1.1754944e-38, %v550_v27  ;;  %v465_v35 = vmul.f32 %v1536_v22, %v1493_v58  ;;  %vm1547_vm9 = vmor %vm529_vm1, %vm530_vm8  ;;  %v533_v13 = vand.u32 2147483647, %v1374_v3  ;;  %v535_v27 = vand.u32 2147483648, %v1374_v3 }
  0xc9   :  { %v293_v31 = vmul.f32 0.3275911, %v277_v49  ;;  %v709_v25 = vsub.f32 0.0, %v277_v49  ;;  %v1552_v48 = vpop.eup %1045  ;;  %v376_v26 = vsub.f32 1.0, %v375_v17  ;;  %v532_v2 = vsel %vm1547_vm9, %v1426_v8, %v528_v9 }
  0xca   :  { %2118 = vst [vmem:[#allocation41_spill] sm:$0xff] %v1552_v48  ;;  %v1554_v60 = vsel %vm549_vm7, %v551_v47, %v547_v19  ;;  %v1560_v34 = vpop.eup %1047  ;;  %v466_v42 = vsub.f32 1.0, %v465_v35  ;;  %1051 = vpow2.f32 %v740_v12  ;;  %v536_v8 = vor.u32 1.1754944e-38, %v535_v27 }
  0xcb   :  { %v1562_v30 = vadd.f32 1.0, %v293_v31  ;;  %v725_v45 = vmul.f32 %v709_v25, %v277_v49  ;;  %v569_v61 = vmul.f32 1.0614054, %v1554_v60  ;;  %v1565_v7 = vpop.eup %1049  ;;  %v1568_v17 = vmul.f32 %v1522_v21, %v376_v26 }
  0xcc   :  { %v390_v19 = vmul.f32 %v1560_v34, %v1501_v0  ;;  %v467_v3 = vmul.f32 %v1536_v22, %v466_v42  ;;  %vm534_vm10 = vcmp.eq.f32.partialorder %v533_v13, 8.507059e+37  ;;  %v513_v31 = vadd.f32 %v1357_v57, %v1437_v23 }
  0xcd   :  { %1053 = vrcp.f32 %v1562_v30  ;;  %v752_v9 = vmul.f32 1.442695, %v725_v45  ;;  %v585_v49 = vadd.f32 -1.4531521, %v569_v61  ;;  %v1574_v35 = vsel %vm534_vm10, %v536_v8, %v532_v2 }
  0xce   :  { %v391_v47 = vsub.f32 1.0, %v390_v19  ;;  %v568_v25 = vmul.f32 1.0614054, %v1574_v35  ;;  %vm515_vm11 = vweird.f32 %v1357_v57  ;;  %v518_v12 = vand.u32 2147483647, %v1300_v36 }
  0xcf   :  { %1055 = vpow2.f32 %v752_v9  ;;  %vm469_vm12 = vweird.f32 %v1493_v58  ;;  %v601_v45 = vmul.f32 %v585_v49, %v1554_v60  ;;  %vm1588_vm13 = vmor %vm514_vm4, %vm515_vm11  ;;  %v520_v23 = vand.u32 2147483648, %v1300_v36 }
  0xd0   :  { %v1583_v42 = vmul.f32 %v1560_v34, %v391_v47  ;;  %v498_v54 = vadd.f32 %v1319_v56, %v1391_v40  ;;  %v584_v13 = vadd.f32 -1.4531521, %v568_v25  ;;  %v517_v26 = vsel %vm1588_vm13, %v1357_v57, %v513_v31  ;;  %v1603_v27 = vpop.eup %1051 }
  0xd1   :  { %vm1598_vm14 = vcmp.eq.f32.partialorder %v518_v12, 8.507059e+37  ;;  %vm500_vm15 = vweird.f32 %v1319_v56  ;;  %2123 = vst [vmem:[#allocation42_spill] sm:$0xff] %v1603_v27  ;;  %vm484_vm0 = vweird.f32 %v1562_v30  ;;  %v617_v19 = vadd.f32 1.4214138, %v601_v45 }
  0xd2   :  { %v521_v36 = vor.u32 1.1754944e-38, %v520_v23  ;;  %vm1608_vm1 = vmor %vm499_vm5, %vm500_vm15  ;;  %v503_v57 = vand.u32 2147483647, %v1283_v20  ;;  %v505_v8 = vand.u32 2147483648, %v1283_v20  ;;  %v600_v47 = vmul.f32 %v584_v13, %v1574_v35 }
  0xd3   :  { %v1054_v9 = vpop.eup %1053  ;;  %v502_v49 = vsel %vm1608_vm1, %v1319_v56, %v498_v54  ;;  %v488_v31 = vand.u32 2147483647, %v1562_v30  ;;  %v490_v25 = vand.u32 2147483648, %v1562_v30  ;;  %v633_v45 = vmul.f32 %v617_v19, %v1554_v60 }
  0xd4   :  { %v480_v12 = vmul.f32 %v1054_v9, %v1562_v30  ;;  %v1624_v61 = vsel %vm1598_vm14, %v521_v36, %v517_v26  ;;  %vm504_vm2 = vcmp.eq.f32.partialorder %v503_v57, 8.507059e+37  ;;  %v616_v23 = vadd.f32 1.4214138, %v600_v47 }
  0xd5   :  { %v1626_v20 = vpop.eup %1055  ;;  %v567_v13 = vmul.f32 1.0614054, %v1624_v61  ;;  %v506_v40 = vor.u32 1.1754944e-38, %v505_v8  ;;  %vm485_vm3 = vweird.f32 %v1054_v9  ;;  %v649_v54 = vadd.f32 -0.28449672, %v633_v45 }
  0xd6   :  { %v481_v56 = vsub.f32 1.0, %v480_v12  ;;  %vm1629_vm4 = vcmp.eq.f32.partialorder %v488_v31, 8.507059e+37  ;;  %v491_v27 = vor.u32 1.1754944e-38, %v490_v25  ;;  %vm454_vm5 = vweird.f32 %v1434_v50  ;;  %vm486_vm9 = vmor %vm484_vm0, %vm485_vm3 }
  0xd7   :  { %v632_v26 = vmul.f32 %v616_v23, %v1574_v35  ;;  %v583_v2 = vadd.f32 -1.4531521, %v567_v13  ;;  %v1635_v19 = vsel %vm504_vm2, %v506_v40, %v502_v49  ;;  %vm470_vm6 = vweird.f32 %v1536_v22 }
  0xd8   :  { %v482_v36 = vmul.f32 %v1054_v9, %v481_v56  ;;  %v665_v57 = vmul.f32 %v649_v54, %v1554_v60  ;;  %v566_v8 = vmul.f32 1.0614054, %v1635_v19  ;;  %v468_v47 = vadd.f32 %v1536_v22, %v467_v3  ;;  %vm1644_vm7 = vmor %vm469_vm12, %vm470_vm6 }
  0xd9   :  { %v648_v31 = vadd.f32 -0.28449672, %v632_v26  ;;  %v599_v12 = vmul.f32 %v583_v2, %v1624_v61  ;;  %v473_v49 = vand.u32 2147483647, %v1493_v58  ;;  %v475_v45 = vand.u32 2147483648, %v1493_v58 }
  0xda   :  { %v681_v23 = vadd.f32 0.2548296, %v665_v57  ;;  %v582_v13 = vadd.f32 -1.4531521, %v566_v8  ;;  %v483_v40 = vadd.f32 %v1054_v9, %v482_v36  ;;  %v472_v3 = vsel %vm1644_vm7, %v1536_v22, %v468_v47 }
  0xdb   :  { %vm809_vm8 = vcmp.ge.f32.partialorder %v1413_v5, 0.0  ;;  %v664_v56 = vmul.f32 %v648_v31, %v1574_v35  ;;  %v615_v54 = vadd.f32 1.4214138, %v599_v12  ;;  %vm474_vm10 = vcmp.eq.f32.partialorder %v473_v49, 8.507059e+37 }
  0xdc   :  { %v476_v26 = vor.u32 1.1754944e-38, %v475_v45  ;;  %v697_v58 = vmul.f32 %v681_v23, %v1554_v60  ;;  %v598_v2 = vmul.f32 %v582_v13, %v1635_v19  ;;  %v487_v36 = vsel %vm486_vm9, %v1054_v9, %v483_v40 }
  0xdd   :  { %v453_v57 = vadd.f32 %v1477_v1, %v1514_v51  ;;  %v680_v22 = vadd.f32 0.2548296, %v664_v56  ;;  %v631_v8 = vmul.f32 %v615_v54, %v1624_v61  ;;  %v1665_v47 = vsel %vm1629_vm4, %v491_v27, %v487_v36 }
  0xde   :  { %v1667_v31 = vsel %vm474_vm10, %v476_v26, %v472_v3  ;;  %vm808_vm11 = vcmp.ge.f32.partialorder %v1337_v10, 0.0  ;;  %v777_v30 = vmul.f32 %v1519_v41, %v697_v58  ;;  %v614_v60 = vadd.f32 1.4214138, %v598_v2 }
  0xdf   :  { %v565_v12 = vmul.f32 1.0614054, %v1665_v47  ;;  %v564_v9 = vmul.f32 1.0614054, %v1667_v31  ;;  %vm439_vm12 = vweird.f32 %v1361_v33  ;;  %v696_v51 = vmul.f32 %v680_v22, %v1574_v35 }
  0xe0   :  { %v647_v25 = vadd.f32 -0.28449672, %v631_v8  ;;  %vm455_vm13 = vweird.f32 %v1477_v1  ;;  %v458_v48 = vand.u32 2147483647, %v1434_v50  ;;  %v793_v27 = vsub.f32 1.0, %v777_v30 }
  0xe1   :  { %v630_v49 = vmul.f32 %v614_v60, %v1635_v19  ;;  %v581_v45 = vadd.f32 -1.4531521, %v565_v12  ;;  %v580_v23 = vadd.f32 -1.4531521, %v564_v9  ;;  %vm1680_vm14 = vmor %vm454_vm5, %vm455_vm13  ;;  %v776_v13 = vmul.f32 %v1490_v63, %v696_v51 }
  0xe2   :  { %v663_v35 = vmul.f32 %v647_v25, %v1624_v61  ;;  %v457_v40 = vsel %vm1680_vm14, %v1477_v1, %v453_v57  ;;  %vm1689_vm15 = vcmp.eq.f32.partialorder %v458_v48, 8.507059e+37  ;;  %v825_v56 = vsub.f32 0.0, %v793_v27 }
  0xe3   :  { %v646_v54 = vadd.f32 -0.28449672, %v630_v49  ;;  %v597_v26 = vmul.f32 %v581_v45, %v1665_v47  ;;  %v596_v58 = vmul.f32 %v580_v23, %v1667_v31  ;;  %v792_v2 = vsub.f32 1.0, %v776_v13 }
  0xe4   :  { %v679_v36 = vadd.f32 0.2548296, %v663_v35  ;;  %v460_v63 = vand.u32 2147483648, %v1434_v50  ;;  %v438_v22 = vadd.f32 %v1415_v52, %v1474_v28  ;;  %vm807_vm0 = vcmp.ge.f32.partialorder %v1275_v15, 0.0 }
  0xe5   :  { %v841_v1 = vsel %vm809_vm8, %v793_v27, %v825_v56  ;;  %v662_v57 = vmul.f32 %v646_v54, %v1635_v19  ;;  %v613_v8 = vadd.f32 1.4214138, %v597_v26  ;;  %v612_v30 = vadd.f32 1.4214138, %v596_v58 }
  0xe6   :  { %vm424_vm1 = vweird.f32 %v1294_v29  ;;  %v873_v60 = vadd.f32 1.0, %v841_v1  ;;  %v824_v12 = vsub.f32 0.0, %v792_v2  ;;  %v695_v9 = vmul.f32 %v679_v36, %v1624_v61 }
  0xe7   :  { %v461_v51 = vor.u32 1.1754944e-38, %v460_v63  ;;  %v678_v50 = vadd.f32 0.2548296, %v662_v57  ;;  %v629_v25 = vmul.f32 %v613_v8, %v1665_v47  ;;  %v628_v28 = vmul.f32 %v612_v30, %v1667_v31 }
  0xe8   :  { %vm440_vm2 = vweird.f32 %v1415_v52  ;;  %vm806_vm3 = vcmp.ge.f32.partialorder %v1254_v62, 0.0  ;;  %v889_v5 = vmul.f32 %v873_v60, %v1457_v53  ;;  %v840_v48 = vsel %vm808_vm11, %v792_v2, %v824_v12 }
  0xe9   :  { %v775_v27 = vmul.f32 %v1421_v18, %v695_v9  ;;  %v1714_v61 = vsel %vm1689_vm15, %v461_v51, %v457_v40  ;;  %v872_v49 = vadd.f32 1.0, %v840_v48  ;;  %v694_v45 = vmul.f32 %v678_v50, %v1635_v19  ;;  %vm1719_vm4 = vmor %vm439_vm12, %vm440_vm2 }
  0xea   :  { %v645_v23 = vadd.f32 -0.28449672, %v629_v25  ;;  %v644_v41 = vadd.f32 -0.28449672, %v628_v28  ;;  %918 = vmatpush.msra.mxu1 %v889_v5  ;;  %979 = vmatpush.msrb.mxu3 %v889_v5  ;;  %v563_v18 = vmul.f32 1.0614054, %v1714_v61  ;;  %v442_v53 = vsel %vm1719_vm4, %v1415_v52, %v438_v22 }
  0xeb   :  { %v791_v10 = vsub.f32 1.0, %v775_v27  ;;  %v443_v35 = vand.u32 2147483647, %v1361_v33  ;;  %v888_v19 = vmul.f32 %v872_v49, %v1443_v24  ;;  %v774_v40 = vmul.f32 %v1376_v4, %v694_v45 }
  0xec   :  { %v661_v3 = vmul.f32 %v645_v23, %v1665_v47  ;;  %v660_v56 = vmul.f32 %v644_v41, %v1667_v31  ;;  %vm409_vm5 = vweird.f32 %v1277_v16  ;;  %v579_v26 = vadd.f32 -1.4531521, %v563_v18 }
  0xed   :  { %v823_v54 = vsub.f32 0.0, %v791_v10  ;;  %vm1733_vm6 = vcmp.eq.f32.partialorder %v443_v35, 8.507059e+37  ;;  %v445_v52 = vand.u32 2147483648, %v1361_v33  ;;  %919 = vmatpush.msra.mxu1 %v888_v19  ;;  %980 = vmatpush.msrb.mxu3 %v888_v19  ;;  %v790_v2 = vsub.f32 1.0, %v774_v40 }
  0xee   :  { %v677_v24 = vadd.f32 0.2548296, %v661_v3  ;;  %v676_v36 = vadd.f32 0.2548296, %v660_v56  ;;  %v423_v4 = vadd.f32 %v1339_v11, %v1418_v46  ;;  %vm804_vm7 = vcmp.ge.f32.partialorder %v1464_v38, 0.0 }
  0xef   :  { %vm805_vm8 = vcmp.ge.f32.partialorder %v1517_v59, 0.0  ;;  %v839_v63 = vsel %vm807_vm0, %v791_v10, %v823_v54  ;;  %v595_v22 = vmul.f32 %v579_v26, %v1714_v61  ;;  %v446_v1 = vor.u32 1.1754944e-38, %v445_v52 }
  0xf0   :  { %vm425_vm9 = vweird.f32 %v1339_v11  ;;  %v871_v33 = vadd.f32 1.0, %v839_v63  ;;  %v822_v57 = vsub.f32 0.0, %v790_v2  ;;  %v693_v8 = vmul.f32 %v677_v24, %v1665_v47 }
  0xf1   :  { %v692_v30 = vmul.f32 %v676_v36, %v1667_v31  ;;  %vm1750_vm10 = vmor %vm424_vm1, %vm425_vm9  ;;  %v611_v60 = vadd.f32 1.4214138, %v595_v22  ;;  %v1756_v15 = vsel %vm1733_vm6, %v446_v1, %v442_v53  ;;  %v428_v9 = vand.u32 2147483647, %v1294_v29 }
  0xf2   :  { %v427_v12 = vsel %vm1750_vm10, %v1339_v11, %v423_v4  ;;  %vm394_vm11 = vweird.f32 %v1501_v0  ;;  %v887_v47 = vmul.f32 %v871_v33, %v1367_v39  ;;  %v838_v31 = vsel %vm806_vm3, %v790_v2, %v822_v57  ;;  %v2149_v4 = vld [vmem:[#allocation39_spill] sm:$0xff] }
  0xf3   :  { %v773_v51 = vmul.f32 %v1626_v20, %v693_v8  ;;  %v772_v50 = vmul.f32 %v1565_v7, %v692_v30  ;;  %v870_v25 = vadd.f32 1.0, %v838_v31  ;;  %v627_v28 = vmul.f32 %v611_v60, %v1714_v61 }
  0xf4   :  { %v562_v5 = vmul.f32 1.0614054, %v1756_v15  ;;  %vm1770_vm12 = vcmp.eq.f32.partialorder %v428_v9, 8.507059e+37  ;;  %920 = vmatpush.msra.mxu1 %v887_v47  ;;  %981 = vmatpush.msrb.mxu3 %v887_v47  ;;  %v430_v62 = vand.u32 2147483648, %v1294_v29  ;;  %v408_v20 = vadd.f32 %v1307_v44, %v1379_v6  ;;  %v2152_v9 = vld [vmem:[#allocation11_spill] sm:$0xff] }
  0xf5   :  { %v789_v48 = vsub.f32 1.0, %v773_v51  ;;  %v788_v39 = vsub.f32 1.0, %v772_v50  ;;  %v886_v7 = vmul.f32 %v870_v25, %v1344_v14  ;;  %v643_v27 = vadd.f32 -0.28449672, %v627_v28 }
  0xf6   :  { %v578_v49 = vadd.f32 -1.4531521, %v562_v5  ;;  %vm410_vm13 = vweird.f32 %v1307_v44  ;;  %v431_v41 = vor.u32 1.1754944e-38, %v430_v62  ;;  %v413_v29 = vand.u32 2147483647, %v1277_v16 }
  0xf7   :  { %v821_v45 = vsub.f32 0.0, %v789_v48  ;;  %v820_v23 = vsub.f32 0.0, %v788_v39  ;;  %vm1781_vm14 = vmor %vm409_vm5, %vm410_vm13  ;;  %921 = vmatpush.msra.mxu1 %v886_v7  ;;  %982 = vmatpush.msrb.mxu3 %v886_v7  ;;  %v659_v6 = vmul.f32 %v643_v27, %v1714_v61  ;;  %v415_v18 = vand.u32 2147483648, %v1277_v16 }
  0xf8   :  { %v594_v14 = vmul.f32 %v578_v49, %v1756_v15  ;;  %v412_v10 = vsel %vm1781_vm14, %v1307_v44, %v408_v20  ;;  %vm379_vm15 = vweird.f32 %v1488_v37  ;;  %v1799_v19 = vsel %vm1770_vm12, %v431_v41, %v427_v12  ;;  %v2156_v49 = vld [vmem:[#allocation40_spill] sm:$0xff] }
  0xf9   :  { %v837_v53 = vsel %vm805_vm8, %v789_v48, %v821_v45  ;;  %v836_v35 = vsel %vm804_vm7, %v788_v39, %v820_v23  ;;  %vm1801_vm0 = vcmp.eq.f32.partialorder %v413_v29, 8.507059e+37  ;;  %v675_v56 = vadd.f32 0.2548296, %v659_v6  ;;  %v2157_v45 = vld [vmem:[#allocation35_spill] sm:$0xff]  ;;  %v2158_v6 = vld [vmem:[#allocation33_spill] sm:$0xff] }
  0xfa   :  { %v869_v3 = vadd.f32 1.0, %v837_v53  ;;  %v868_v44 = vadd.f32 1.0, %v836_v35  ;;  %v610_v16 = vadd.f32 1.4214138, %v594_v14  ;;  %vm803_vm1 = vcmp.ge.f32.partialorder %v1404_v43, 0.0 }
  0xfb   :  { %v561_v59 = vmul.f32 1.0614054, %v1799_v19  ;;  %v416_v54 = vor.u32 1.1754944e-38, %v415_v18  ;;  %v393_v38 = vadd.f32 %v1560_v34, %v1583_v42  ;;  %vm395_vm2 = vweird.f32 %v1560_v34 }
  0xfc   :  { %v885_v26 = vmul.f32 %v869_v3, %v1526_v55  ;;  %v884_v58 = vmul.f32 %v868_v44, %v1499_v32  ;;  %v691_v52 = vmul.f32 %v675_v56, %v1714_v61  ;;  %v626_v2 = vmul.f32 %v610_v16, %v1756_v15  ;;  %vm1816_vm3 = vmor %vm394_vm11, %vm395_vm2  ;;  %v2148_v61 = vld [vmem:[#allocation28_spill] sm:$0xff] }
  0xfd   :  { %v577_v36 = vadd.f32 -1.4531521, %v561_v59  ;;  %v1822_v42 = vsel %vm1801_vm0, %v416_v54, %v412_v10  ;;  %v397_v55 = vsel %vm1816_vm3, %v1560_v34, %v393_v38  ;;  %v398_v32 = vand.u32 2147483647, %v1501_v0  ;;  %v2160_v10 = vld [vmem:[#allocation31_spill] sm:$0xff] }
  0xfe   :  { %vm364_vm4 = vweird.f32 %v2148_v61  ;;  %922 = vmatpush.msra.mxu1 %v885_v26  ;;  %983 = vmatpush.msrb.mxu3 %v885_v26  ;;  %v771_v63 = vmul.f32 %v2149_v4, %v691_v52  ;;  %v642_v22 = vadd.f32 -0.28449672, %v626_v2  ;;  %v560_v1 = vmul.f32 1.0614054, %v1822_v42  ;;  %v2165_v52 = vld [vmem:[#allocation5_spill] sm:$0xff]  ;;  %v2185_v26 = vld [vmem:[#allocation19_spill] sm:$0xff] }
  0xff   :  { %v400_v33 = vand.u32 2147483648, %v1501_v0  ;;  %v593_v57 = vmul.f32 %v577_v36, %v1799_v19  ;;  %vm1833_vm5 = vcmp.eq.f32.partialorder %v398_v32, 8.507059e+37  ;;  %vm380_vm6 = vweird.f32 %v1522_v21  ;;  %v2167_v32 = vld [vmem:[#allocation20_spill] sm:$0xff] }
 0x100   :  { %v383_v34 = vand.u32 2147483647, %v1488_v37  ;;  %923 = vmatpush.msra.mxu1 %v884_v58  ;;  %984 = vmatpush.msrb.mxu3 %v884_v58  ;;  %v787_v30 = vsub.f32 1.0, %v771_v63  ;;  %v658_v46 = vmul.f32 %v642_v22, %v1756_v15  ;;  %v576_v60 = vadd.f32 -1.4531521, %v560_v1  ;;  %vm381_vm9 = vmor %vm379_vm15, %vm380_vm6 }
 0x101   :  { %v401_v12 = vor.u32 1.1754944e-38, %v400_v33  ;;  %vm349_vm7 = vweird.f32 %v2152_v9  ;;  %v609_v0 = vadd.f32 1.4214138, %v593_v57  ;;  %v378_v47 = vadd.f32 %v1522_v21, %v1568_v17  ;;  %v2155_v17 = vld [vmem:[#allocation13_spill] sm:$0xff] }
 0x102   :  { %vm1843_vm8 = vcmp.eq.f32.partialorder %v383_v34, 8.507059e+37  ;;  %v385_v51 = vand.u32 2147483648, %v1488_v37  ;;  %v819_v50 = vsub.f32 0.0, %v787_v30  ;;  %v674_v25 = vadd.f32 0.2548296, %v658_v46  ;;  %v2171_v46 = vld [vmem:[#allocation22_spill] sm:$0xff] }
 0x103   :  { %v592_v28 = vmul.f32 %v576_v60, %v1822_v42  ;;  %v1851_v5 = vsel %vm1833_vm5, %v401_v12, %v397_v55  ;;  %vm802_vm10 = vcmp.ge.f32.partialorder %v2155_v17, 0.0  ;;  %v625_v11 = vmul.f32 %v609_v0, %v1799_v19  ;;  %v2166_v55 = vld [vmem:[#allocation29_spill] sm:$0xff] }
 0x104   :  { %v559_v48 = vmul.f32 1.0614054, %v1851_v5  ;;  %v382_v39 = vsel %vm381_vm9, %v1522_v21, %v378_v47  ;;  %v386_v62 = vor.u32 1.1754944e-38, %v385_v51  ;;  %v835_v20 = vsel %vm803_vm1, %v787_v30, %v819_v50  ;;  %v2170_v30 = vld [vmem:[#allocation2_spill] sm:$0xff] }
 0x105   :  { %v690_v7 = vmul.f32 %v674_v25, %v1756_v15  ;;  %v608_v27 = vadd.f32 1.4214138, %v592_v28  ;;  %v363_v23 = vadd.f32 %v2157_v45, %v2156_v49  ;;  %v867_v37 = vadd.f32 1.0, %v835_v20  ;;  %v2159_v15 = vld [vmem:[#allocation8_spill] sm:$0xff]  ;;  %v2172_v25 = vld [vmem:[#allocation27_spill] sm:$0xff] }
 0x106   :  { %v641_v41 = vadd.f32 -0.28449672, %v625_v11  ;;  %v575_v13 = vadd.f32 -1.4531521, %v559_v48  ;;  %v1868_v29 = vsel %vm1843_vm8, %v386_v62, %v382_v39  ;;  %vm365_vm11 = vweird.f32 %v2157_v45  ;;  %v2175_v39 = vld [vmem:[#allocation16_spill] sm:$0xff] }
 0x107   :  { %v770_v14 = vmul.f32 %v2158_v6, %v690_v7  ;;  %v624_v21 = vmul.f32 %v608_v27, %v1822_v42  ;;  %v558_v43 = vmul.f32 1.0614054, %v1868_v29  ;;  %vm334_vm12 = vweird.f32 %v2159_v15  ;;  %vm1880_vm13 = vmor %vm364_vm4, %vm365_vm11 }
 0x108   :  { %v883_v18 = vmul.f32 %v867_v37, %v2160_v10  ;;  %v657_v53 = vmul.f32 %v641_v41, %v1799_v19  ;;  %v591_v35 = vmul.f32 %v575_v13, %v1851_v5  ;;  %v368_v3 = vand.u32 2147483647, %v2148_v61  ;;  %v2178_v37 = vld [vmem:[#allocation14_spill] sm:$0xff] }
 0x109   :  { %v786_v44 = vsub.f32 1.0, %v770_v14  ;;  %v640_v56 = vadd.f32 -0.28449672, %v624_v21  ;;  %v574_v16 = vadd.f32 -1.4531521, %v558_v43  ;;  %v367_v59 = vsel %vm1880_vm13, %v2157_v45, %v363_v23  ;;  %v2177_v23 = vld [vmem:[#allocation24_spill] sm:$0xff] }
 0x10a   :  { %924 = vmatpush.msra.mxu1 %v883_v18  ;;  %985 = vmatpush.msrb.mxu3 %v883_v18  ;;  %v673_v54 = vadd.f32 0.2548296, %v657_v53  ;;  %v607_v38 = vadd.f32 1.4214138, %v591_v35  ;;  %vm1888_vm14 = vcmp.eq.f32.partialorder %v368_v3, 8.507059e+37  ;;  %v370_v58 = vand.u32 2147483648, %v2148_v61 }
 0x10b   :  { %vm801_vm15 = vcmp.ge.f32.partialorder %v2165_v52, 0.0  ;;  %v818_v2 = vsub.f32 0.0, %v786_v44  ;;  %v656_v24 = vmul.f32 %v640_v56, %v1822_v42  ;;  %v590_v36 = vmul.f32 %v574_v16, %v1868_v29  ;;  %v2179_v13 = vld [vmem:[#allocation34_spill] sm:$0xff] }
 0x10c   :  { %v348_v4 = vadd.f32 %v2167_v32, %v2166_v55  ;;  %v689_v63 = vmul.f32 %v673_v54, %v1799_v19  ;;  %v623_v22 = vmul.f32 %v607_v38, %v1851_v5  ;;  %v371_v1 = vor.u32 1.1754944e-38, %v370_v58  ;;  %v2182_v16 = vld [vmem:[#allocation42_spill] sm:$0xff] }
 0x10d   :  { %vm350_vm0 = vweird.f32 %v2167_v32  ;;  %v834_v61 = vsel %vm802_vm10, %v786_v44, %v818_v2  ;;  %v672_v33 = vadd.f32 0.2548296, %v656_v24  ;;  %v606_v57 = vadd.f32 1.4214138, %v590_v36 }
 0x10e   :  { %vm1905_vm1 = vmor %vm349_vm7, %vm350_vm0  ;;  %v353_v34 = vand.u32 2147483647, %v2152_v9  ;;  %vm800_vm2 = vcmp.ge.f32.partialorder %v2170_v30, 0.0  ;;  %v866_v19 = vadd.f32 1.0, %v834_v61  ;;  %v769_v60 = vmul.f32 %v2171_v46, %v689_v63  ;;  %v2186_v63 = vld [vmem:[#allocation41_spill] sm:$0xff]  ;;  %v2188_v61 = vld [vmem:[#allocation26_spill] sm:$0xff] }
 0x10f   :  { %v639_v12 = vadd.f32 -0.28449672, %v623_v22  ;;  %v1914_v0 = vsel %vm1888_vm14, %v371_v1, %v367_v59  ;;  %v688_v47 = vmul.f32 %v672_v33, %v1822_v42  ;;  %v622_v31 = vmul.f32 %v606_v57, %v1868_v29  ;;  %v2176_v42 = vld [vmem:[#allocation17_spill] sm:$0xff]  ;;  %v2189_v57 = vld [vmem:[#allocation15_spill] sm:$0xff] }
 0x110   :  { %v557_v51 = vmul.f32 1.0614054, %v1914_v0  ;;  %v352_v50 = vsel %vm1905_vm1, %v2167_v32, %v348_v4  ;;  %v882_v28 = vmul.f32 %v866_v19, %v2172_v25  ;;  %v785_v17 = vsub.f32 1.0, %v769_v60 }
 0x111   :  { %v655_v11 = vmul.f32 %v639_v12, %v1851_v5  ;;  %vm1924_vm3 = vcmp.eq.f32.partialorder %v353_v34, 8.507059e+37  ;;  %vm319_vm4 = vweird.f32 %v2175_v39  ;;  %v768_v62 = vmul.f32 %v2176_v42, %v688_v47  ;;  %v2192_v42 = vld [vmem:[#allocation32_spill] sm:$0xff] }
 0x112   :  { %v638_v20 = vadd.f32 -0.28449672, %v622_v31  ;;  %v573_v7 = vadd.f32 -1.4531521, %v557_v51  ;;  %v355_v27 = vand.u32 2147483648, %v2152_v9  ;;  %925 = vmatpush.msra.mxu1 %v882_v28  ;;  %986 = vmatpush.msrb.mxu3 %v882_v28  ;;  %v817_v49 = vsub.f32 0.0, %v785_v17 }
 0x113   :  { %v671_v45 = vadd.f32 0.2548296, %v655_v11  ;;  %v333_v41 = vadd.f32 %v2178_v37, %v2177_v23  ;;  %vm335_vm5 = vweird.f32 %v2178_v37  ;;  %vm799_vm6 = vcmp.ge.f32.partialorder %v2179_v13, 0.0 }
 0x114   :  { %v784_v6 = vsub.f32 1.0, %v768_v62  ;;  %v654_v14 = vmul.f32 %v638_v20, %v1868_v29  ;;  %v589_v21 = vmul.f32 %v573_v7, %v1914_v0  ;;  %v356_v43 = vor.u32 1.1754944e-38, %v355_v27  ;;  %vm1939_vm7 = vmor %vm334_vm12, %vm335_vm5  ;;  %v2193_v7 = vld [vmem:[#allocation38_spill] sm:$0xff] }
 0x115   :  { %v833_v10 = vsel %vm801_vm15, %v785_v17, %v817_v49  ;;  %v687_v18 = vmul.f32 %v671_v45, %v1851_v5  ;;  %v337_v53 = vsel %vm1939_vm7, %v2178_v37, %v333_v41  ;;  %v338_v35 = vand.u32 2147483647, %v2159_v15  ;;  %v2194_v37 = vld [vmem:[#allocation30_spill] sm:$0xff] }
 0x116   :  { %v865_v40 = vadd.f32 1.0, %v833_v10  ;;  %v816_v3 = vsub.f32 0.0, %v784_v6  ;;  %v670_v44 = vadd.f32 0.2548296, %v654_v14  ;;  %v605_v56 = vadd.f32 1.4214138, %v589_v21 }
 0x117   :  { %v767_v59 = vmul.f32 %v2182_v16, %v687_v18  ;;  %v1953_v54 = vsel %vm1924_vm3, %v356_v43, %v352_v50  ;;  %vm1955_vm8 = vcmp.eq.f32.partialorder %v338_v35, 8.507059e+37  ;;  %v340_v5 = vand.u32 2147483648, %v2159_v15  ;;  %v2187_v15 = vld [vmem:[#allocation36_spill] sm:$0xff]  ;;  %v2195_v14 = vld [vmem:[#allocation37_spill] sm:$0xff]  ;;  %v2196_v10 = vld [vmem:[#allocation18_spill] sm:$0xff] }
 0x118   :  { %v881_v58 = vmul.f32 %v865_v40, %v2185_v26  ;;  %v832_v52 = vsel %vm800_vm2, %v784_v6, %v816_v3  ;;  %v686_v2 = vmul.f32 %v670_v44, %v1868_v29  ;;  %v621_v24 = vmul.f32 %v605_v56, %v1914_v0  ;;  %v2197_v40 = vld [vmem:[#allocation25_spill] sm:$0xff]  ;;  %v2198_v56 = vld [vmem:[#allocation12_spill] sm:$0xff] }
 0x119   :  { %v864_v36 = vadd.f32 1.0, %v832_v52  ;;  %v783_v55 = vsub.f32 1.0, %v767_v59  ;;  %v556_v32 = vmul.f32 1.0614054, %v1953_v54  ;;  %v341_v4 = vor.u32 1.1754944e-38, %v340_v5  ;;  %v2200_v52 = vld [vmem:[#allocation23_spill] sm:$0xff] }
 0x11a   :  { %926 = vmatpush.msra.mxu1 %v881_v58  ;;  %987 = vmatpush.msrb.mxu3 %v881_v58  ;;  %v766_v22 = vmul.f32 %v2186_v63, %v686_v2  ;;  %v637_v1 = vadd.f32 -0.28449672, %v621_v24  ;;  %v318_v33 = vadd.f32 %v2188_v61, %v2187_v15  ;;  %vm320_vm9 = vweird.f32 %v2188_v61 }
 0x11b   :  { %v880_v8 = vmul.f32 %v864_v36, %v2189_v57  ;;  %v815_v29 = vsub.f32 0.0, %v783_v55  ;;  %v572_v34 = vadd.f32 -1.4531521, %v556_v32  ;;  %v342_v30 = vsel %vm1955_vm8, %v341_v4, %v337_v53  ;;  %vm1975_vm10 = vmor %vm319_vm4, %vm320_vm9  ;;  %v2201_v4 = vld [vmem:[#allocation21_spill] sm:$0xff] }
 0x11c   :  { %v782_v46 = vsub.f32 1.0, %v766_v22  ;;  %v653_v60 = vmul.f32 %v637_v1, %v1914_v0  ;;  %v555_v12 = vmul.f32 1.0614054, %v342_v30  ;;  %v322_v47 = vsel %vm1975_vm10, %v2188_v61, %v318_v33 }
 0x11d   :  { %927 = vmatpush.msra.mxu1 %v880_v8  ;;  %988 = vmatpush.msrb.mxu3 %v880_v8  ;;  %v831_v31 = vsel %vm799_vm6, %v783_v55, %v815_v29  ;;  %v588_v51 = vmul.f32 %v572_v34, %v1953_v54  ;;  %v323_v50 = vand.u32 2147483647, %v2175_v39  ;;  %v325_v25 = vand.u32 2147483648, %v2175_v39 }
 0x11e   :  { %v863_v28 = vadd.f32 1.0, %v831_v31  ;;  %v814_v17 = vsub.f32 0.0, %v782_v46  ;;  %v669_v11 = vadd.f32 0.2548296, %v653_v60  ;;  %v571_v48 = vadd.f32 -1.4531521, %v555_v12 }
 0x11f   :  { %vm798_vm11 = vcmp.ge.f32.partialorder %v2192_v42, 0.0  ;;  %v604_v62 = vadd.f32 1.4214138, %v588_v51  ;;  %vm324_vm12 = vcmp.eq.f32.partialorder %v323_v50, 8.507059e+37  ;;  %v326_v20 = vor.u32 1.1754944e-38, %v325_v25  ;;  %v2202_v31 = vld [vmem:[#allocation7_spill] sm:$0xff] }
 0x120   :  { %v879_v27 = vmul.f32 %v863_v28, %v2193_v7  ;;  %v830_v49 = vsel %vm798_vm11, %v782_v46, %v814_v17  ;;  %v685_v45 = vmul.f32 %v669_v11, %v1914_v0  ;;  %v587_v23 = vmul.f32 %v571_v48, %v342_v30  ;;  %v2203_v25 = vld [vmem:[#allocation6_spill] sm:$0xff]  ;;  %v2204_v42 = vld [vmem:[#allocation4_spill] sm:$0xff] }
 0x121   :  { %v846_v41 = vmul.f32 0.5, %v2194_v37  ;;  %v862_v13 = vadd.f32 1.0, %v830_v49  ;;  %v620_v39 = vmul.f32 %v604_v62, %v1953_v54  ;;  %v327_v6 = vsel %vm324_vm12, %v326_v20, %v322_v47 }
 0x122   :  { %928 = vmatpush.msra.mxu1 %v879_v27  ;;  %989 = vmatpush.msrb.mxu3 %v879_v27  ;;  %v765_v21 = vmul.f32 %v2195_v14, %v685_v45  ;;  %v603_v43 = vadd.f32 1.4214138, %v587_v23  ;;  %v554_v9 = vmul.f32 1.0614054, %v327_v6  ;;  %v732_v18 = vmul.f32 1.442695, %v2196_v10 }
 0x123   :  { %v878_v53 = vmul.f32 %v862_v13, %v846_v41  ;;  %v636_v35 = vadd.f32 -0.28449672, %v620_v39  ;;  %1057 = vpow2.f32 %v2197_v40  ;;  %v2199_v16 = vsub.f32 0.0, %v2198_v56  ;;  %v2205_v27 = vld [vmem:[#allocation3_spill] sm:$0xff]  ;;  %v2206_v13 = vld [vmem:[#allocation10_spill] sm:$0xff]  ;;  %v893_v10 = vld [vmem:[%s2037_s3 + $0x18] sm:$0xff] }
 0x124   :  { %v781_v0 = vsub.f32 1.0, %v765_v21  ;;  %v619_v3 = vmul.f32 %v603_v43, %v342_v30  ;;  %v570_v44 = vadd.f32 -1.4531521, %v554_v9  ;;  %1059 = vpow2.f32 %v732_v18  ;;  %v890_v9 = vld [vmem:[%s2037_s3] sm:$0xff]  ;;  %v891_v18 = vld [vmem:[%s2037_s3 + $0x8] sm:$0xff] }
 0x125   :  { %v714_v59 = vmul.f32 %v2199_v16, %v2198_v56  ;;  %929 = vmatpush.msra.mxu1 %v878_v53  ;;  %990 = vmatpush.msrb.mxu3 %v878_v53  ;;  %v652_v38 = vmul.f32 %v636_v35, %v1953_v54  ;;  %vm797_vm13 = vcmp.ge.f32.partialorder %v2200_v52, 0.0  ;;  %v845_v63 = vmul.f32 0.5, %v2201_v4  ;;  %v892_v53 = vld [vmem:[%s2037_s3 + $0x10] sm:$0xff]  ;;  %v901_v35 = vpop.permute.xlu1 %900  ;;  %v906_v16 = vpop.permute.xlu2 %905 }
 0x126   :  { %v813_v5 = vsub.f32 0.0, %v781_v0  ;;  %v635_v26 = vadd.f32 -0.28449672, %v619_v3  ;;  %v586_v58 = vmul.f32 %v570_v44, %v327_v6  ;;  %vm796_vm14 = vcmp.ge.f32.partialorder %v2202_v31, 0.0 }
 0x127   :  { %v668_v2 = vadd.f32 0.2548296, %v652_v38  ;;  %v730_v32 = vmul.f32 1.442695, %v714_v59  ;;  %v844_v28 = vmul.f32 0.5, %v2203_v25  ;;  %vm795_vm15 = vcmp.ge.f32.partialorder %v2204_v42, 0.0 }
 0x128   :  { %v829_v24 = vsel %vm797_vm13, %v781_v0, %v813_v5  ;;  %v651_v36 = vmul.f32 %v635_v26, %v342_v30  ;;  %v602_v55 = vadd.f32 1.4214138, %v586_v58  ;;  %v843_v49 = vmul.f32 0.5, %v2205_v27  ;;  %v911_v5 = vpop.permute.xlu0 %910 }
 0x129   :  { %v861_v22 = vadd.f32 1.0, %v829_v24  ;;  %v684_v1 = vmul.f32 %v668_v2, %v1953_v54  ;;  %v1058_v15 = vpop.eup %1057  ;;  %1061 = vpow2.f32 %v730_v32  ;;  %vm794_vm0 = vcmp.ge.f32.partialorder %v2206_v13, 0.0 }
 0x12a   :  { %v667_v61 = vadd.f32 0.2548296, %v651_v36  ;;  %v618_v33 = vmul.f32 %v602_v55, %v327_v6  ;;  %v1060_v19 = vpop.eup %1059 }
 0x12b   :  { %v877_v57 = vmul.f32 %v861_v22, %v845_v63  ;;  %v764_v8 = vmul.f32 %v1058_v15, %v684_v1 }
 0x12c   :  { %v683_v29 = vmul.f32 %v667_v61, %v342_v30  ;;  %v634_v34 = vadd.f32 -0.28449672, %v618_v33 }
 0x12d   :  { %930 = vmatpush.msra.mxu1 %v877_v57  ;;  %991 = vmatpush.msrb.mxu3 %v877_v57  ;;  %v780_v46 = vsub.f32 1.0, %v764_v8  ;;  %v916_v3 = vpop.permute.xlu1 %915 }
 0x12e   :  { %v763_v60 = vmul.f32 %v1060_v19, %v683_v29  ;;  %v650_v12 = vmul.f32 %v634_v34, %v327_v6 }
 0x12f   :  { %v812_v47 = vsub.f32 0.0, %v780_v46  ;;  %v1062_v30 = vpop.eup %1061 }
 0x130   :  { %v779_v51 = vsub.f32 1.0, %v763_v60  ;;  %v666_v50 = vadd.f32 0.2548296, %v650_v12 }
 0x131   :  { %v828_v54 = vsel %vm796_vm14, %v780_v46, %v812_v47 }
 0x132   :  { %v860_v17 = vadd.f32 1.0, %v828_v54  ;;  %v811_v11 = vsub.f32 0.0, %v779_v51  ;;  %v682_v48 = vmul.f32 %v666_v50, %v327_v6  ;;  %v2207_v6 = vld [vmem:[#allocation9_spill] sm:$0xff] }
 0x133   :  { %v842_v14 = vmul.f32 0.5, %v2207_v6 }
 0x134   :  { %v876_v62 = vmul.f32 %v860_v17, %v844_v28  ;;  %v827_v20 = vsel %vm795_vm15, %v779_v51, %v811_v11  ;;  %v762_v7 = vmul.f32 %v1062_v30, %v682_v48 }
 0x135   :  { %v859_v45 = vadd.f32 1.0, %v827_v20 }
 0x136   :  { %931 = vmatpush.msra.mxu1 %v876_v62  ;;  %992 = vmatpush.msrb.mxu3 %v876_v62  ;;  %v778_v23 = vsub.f32 1.0, %v762_v7 }
 0x137   :  { %v875_v37 = vmul.f32 %v859_v45, %v843_v49 }
 0x138   :  { %v810_v41 = vsub.f32 0.0, %v778_v23 }
 0x139   :  { %932 = vmatpush.msra.mxu1 %v875_v37  ;;  %993 = vmatpush.msrb.mxu3 %v875_v37 }
 0x13a   :  { %v826_v39 = vsel %vm794_vm0, %v778_v23, %v810_v41 }
 0x13b   :  { %v858_v21 = vadd.f32 1.0, %v826_v39 }
 0x13d   :  { %v874_v43 = vmul.f32 %v858_v21, %v842_v14 }
 0x13f   :  { %933 = vmatpush.msra.mxu1 %v874_v43  ;;  %994 = vmatpush.msrb.mxu3 %v874_v43 }
 0x140   :  { %934 = vmatmul.f32.vlgmr.msra.gmra.mxu1 %v890_v9  ;;  %943 = vmatmul.f32.vlgmr.msrb.gmra.mxu3 %v893_v10 }
 0x148   :  { %937 = vmatmul.f32.gmra.mxu1 %v891_v18 }
 0x150   :  { %940 = vmatmul.f32.gmra.mxu1 %v892_v53 }
 0x1bd   :  { %v935_v40 = vpop.f32.mrf.mxu1 }
 0x1be   :  { %v936_v0 = vadd.f32 %v935_v40, %v901_v35 }
 0x1c0   :  { %947 = vst [vmem:[%s2038_s5] sm:$0xff] %v936_v0 }
 0x1c3   :  { %v944_v44 = vpop.f32.mrf.mxu3 }
 0x1c4   :  { %v945_v56 = vadd.f32 %v944_v44, %v916_v3 }
 0x1c5   :  { %v938_v59 = vpop.f32.mrf.mxu1 }
 0x1c6   :  { %950 = vst [vmem:[%s2038_s5 + $0x18] sm:$0xff] %v945_v56  ;;  %v939_v38 = vadd.f32 %v938_v59, %v906_v16 }
 0x1c8   :  { %948 = vst [vmem:[%s2038_s5 + $0x8] sm:$0xff] %v939_v38 }
 0x1cd   :  { %v941_v26 = vpop.f32.mrf.mxu1 }
 0x1ce   :  { %v942_v58 = vadd.f32 %v941_v26, %v911_v5 }
 0x1d0   :  { %949 = vst [vmem:[%s2038_s5 + $0x10] sm:$0xff] %v942_v58 }

</bundles_post_ra>
